<compile_context>
chip_gen: v7x
topology: tpu7x:2x2x1
jax: 0.10.0
libtpu: 0.0.40
codegen_flags: <defaults>
</compile_context>

<pallas_src>
import functools

import jax
import jax.numpy as jnp
from jax.experimental import pallas as pl
from jax.experimental.pallas import tpu as pltpu


# ------------------------- Pallas kernel -------------------------

def _lstm_kernel(x_ref, w_ih0_ref, b0_ref, w_hh0_ref, w_ih1_ref, w_hh1_ref, b1_ref,
                 y_ref, state_scr, *, hidden_size, batch, t_chunk):
    """Runs `t_chunk` LSTM timesteps (2 stacked layers) per grid step.

    x_ref     : (1, Tc*B, D_in) f32   raw features for this time chunk (step-major rows)
    w_ih0_ref : (D_in, 4H)      f32   layer-0 input weight (transposed)
    b0_ref    : (1, 4H)         f32   layer-0 bias (b_ih + b_hh)
    w_hh0_ref : (H, 4H)         bf16  layer-0 recurrent weight (transposed)
    w_ih1_ref : (H, 4H)         bf16  layer-1 input weight (transposed)
    w_hh1_ref : (H, 4H)         bf16  layer-1 recurrent weight (transposed)
    b1_ref    : (1, 4H)         f32   layer-1 bias (b_ih + b_hh)
    y_ref     : (1, B, Tc*H)    f32   layer-1 hidden states, Tc steps packed along lanes
    state_scr : (4, B, H)       f32   persistent [h0, c0, h1, c1] across time chunks
    """
    H = hidden_size
    B = batch
    c_idx = pl.program_id(0)

    @pl.when(c_idx == 0)
    def _():
        state_scr[...] = jnp.zeros_like(state_scr)

    # Load persistent state into vregs once per chunk.
    h0 = state_scr[0]
    c0 = state_scr[1]
    h1 = state_scr[2]
    c1 = state_scr[3]

    # bf16 MXU operands (f32 accumulation below).
    w_hh0 = w_hh0_ref[...]
    w_ih1 = w_ih1_ref[...]
    w_hh1 = w_hh1_ref[...]
    # Hoist the b1 broadcast out of the unrolled loop (broadcast_in_dim is not CSE'd).
    b1b = jnp.broadcast_to(b1_ref[...], (B, 4 * H))

    # Layer-0 input projection for the WHOLE chunk: one batched matmul, off the per-step
    # serial path.  Streams x instead of a (T, B, 4H) pre0 HBM intermediate.
    x2d = x_ref[0]                                                     # (Tc*B, D_in)
    pre0 = jnp.dot(x2d, w_ih0_ref[...],
                   preferred_element_type=jnp.float32) + b0_ref[...]   # (Tc*B, 4H)

    def gates_to_hc(g, c_prev):
        # Gate order [i | f | g | o].  Full-vreg sigmoid (3/4 used); tanh only on g slice.
        s = jax.nn.sigmoid(g)                       # (B, 4H)
        gg = jnp.tanh(g[:, 2 * H:3 * H])            # (B, H)
        c_new = s[:, H:2 * H] * c_prev + s[:, 0:H] * gg
        h_new = s[:, 3 * H:4 * H] * jnp.tanh(c_new)
        return h_new, c_new

    # Note: explicit MXU weight residency (pltpu.matmul_push_rhs / matmul_acc_lhs /
    # matmul_pop) would cut per-step latency further at M=2; intentionally not used here.

    ys = []
    for step in range(t_chunk):
        # ---- layer 0: only the recurrent matmul is on the serial path (bf16 x bf16 -> f32)
        g0 = pre0[step * B:(step + 1) * B, :] + jnp.dot(
            h0.astype(jnp.bfloat16), w_hh0, preferred_element_type=jnp.float32)
        h0, c0 = gates_to_hc(g0, c0)

        # ---- layer 1: two small dots, no per-step lane concat, f32 accumulate
        g1 = (jnp.dot(h0.astype(jnp.bfloat16), w_ih1, preferred_element_type=jnp.float32)
              + jnp.dot(h1.astype(jnp.bfloat16), w_hh1, preferred_element_type=jnp.float32)
              + b1b)
        h1, c1 = gates_to_hc(g1, c1)

        ys.append(h1)  # unmasked; padded positions are zeroed in the wrapper

    # Lane-dense output store: one (B, Tc*H) store per chunk, at the epilogue.
    y_ref[0] = jnp.concatenate(ys, axis=-1)

    # Write state back once per chunk.
    state_scr[0] = h0
    state_scr[1] = c0
    state_scr[2] = h1
    state_scr[3] = c1


def lstm_pallas(x_chunks, w_ih0, b0, w_hh0_bf, w_ih1_bf, w_hh1_bf, b1,
                *, hidden_size, batch, t_chunk):
    """x_chunks: (n_chunks, Tc*B, D_in).  Returns lane-packed h1: (n_chunks, B, Tc*H)."""
    n_chunks, tcb, D_in = x_chunks.shape
    H = hidden_size
    B = batch
    assert tcb == t_chunk * B

    kernel = functools.partial(_lstm_kernel, hidden_size=H, batch=B, t_chunk=t_chunk)

    return pl.pallas_call(
        kernel,
        out_shape=jax.ShapeDtypeStruct((n_chunks, B, t_chunk * H), jnp.float32),
        grid_spec=pltpu.PrefetchScalarGridSpec(
            num_scalar_prefetch=0,
            grid=(n_chunks,),
            in_specs=[
                pl.BlockSpec((1, t_chunk * B, D_in), lambda c: (c, 0, 0)),  # x chunk
                pl.BlockSpec((D_in, 4 * H), lambda c: (0, 0)),              # W_ih layer0 (f32)
                pl.BlockSpec((1, 4 * H), lambda c: (0, 0)),                 # bias layer0
                pl.BlockSpec((H, 4 * H), lambda c: (0, 0)),                 # W_hh layer0 (bf16)
                pl.BlockSpec((H, 4 * H), lambda c: (0, 0)),                 # W_ih layer1 (bf16)
                pl.BlockSpec((H, 4 * H), lambda c: (0, 0)),                 # W_hh layer1 (bf16)
                pl.BlockSpec((1, 4 * H), lambda c: (0, 0)),                 # bias layer1
            ],
            out_specs=pl.BlockSpec((1, B, t_chunk * H), lambda c: (c, 0, 0)),
            scratch_shapes=[
                pltpu.VMEM((4, B, H), jnp.float32),   # [h0, c0, h1, c1]
            ],
        ),
        compiler_params=pltpu.CompilerParams(
            dimension_semantics=("arbitrary",),        # sequential recurrence over time chunks
        ),
    )(x_chunks, w_ih0, b0, w_hh0_bf, w_ih1_bf, w_hh1_bf, b1)


# ------------------------- Model wrapper (glue in plain JAX) -------------------------

def init_params(key, *, feat_dim, icd9_embeddings, emb_dim, hidden_size, target_size):
    D_in = (feat_dim - 1) + emb_dim
    H = hidden_size
    k_lstm = 1.0 / jnp.sqrt(H)
    keys = jax.random.split(key, 12)
    u = lambda k, shape, bound: jax.random.uniform(k, shape, jnp.float32, -bound, bound)
    params = {
        "embedding": jax.random.normal(keys[0], (icd9_embeddings + 1, emb_dim), jnp.float32),
        # LSTM weights stored pre-transposed for x @ W.T style matmuls.
        "w_ih0_t": u(keys[1], (D_in, 4 * H), k_lstm),
        "w_hh0_t": u(keys[2], (H, 4 * H), k_lstm),
        "b0":      u(keys[3], (1, 4 * H), k_lstm) + u(keys[4], (1, 4 * H), k_lstm),  # b_ih + b_hh
        "w_ih1_t": u(keys[5], (H, 4 * H), k_lstm),
        "w_hh1_t": u(keys[6], (H, 4 * H), k_lstm),
        "b1":      u(keys[7], (1, 4 * H), k_lstm) + u(keys[8], (1, 4 * H), k_lstm),
        "w_out_t": u(keys[9], (H, target_size), 1.0 / jnp.sqrt(H)),
        "b_out":   u(keys[10], (1, target_size), 1.0 / jnp.sqrt(H)),
    }
    return params


def lstm_forward(data, lengths, params, *, hidden_size, target_size, t_chunk=32):
    """data: (B, T, F) float32, last column holds integer icd9 codes; lengths: (B,) int32."""
    B, T, F = data.shape
    H = hidden_size
    # TODO(synk): `normalize` / `feature_split` are external helpers not defined in the module;
    # treated as identity here.
    icd9 = data[:, :, -1].astype(jnp.int32)
    icd9_emb = jnp.take(params["embedding"], icd9, axis=0)          # (B, T, 64)
    feats = jnp.concatenate([data[:, :, :-1], icd9_emb], axis=-1)    # (B, T, D_in)

    # Time-major for the recurrence.
    x_tm = jnp.transpose(feats, (1, 0, 2))                           # (T, B, D_in)
    D_in = x_tm.shape[-1]

    # Pad time to a multiple of the chunk size (padded steps produce garbage state beyond all
    # sequence lengths; their outputs are discarded below).
    tc = max(1, min(t_chunk, T))
    n_chunks = (T + tc - 1) // tc
    T_pad = n_chunks * tc
    if T_pad != T:
        x_tm = jnp.pad(x_tm, ((0, T_pad - T), (0, 0), (0, 0)))

    # (n_chunks, Tc*B, D_in): the kernel does one (Tc*B, D_in) @ (D_in, 4H) matmul per chunk.
    x_chunks = x_tm.reshape(n_chunks, tc * B, D_in)

    packed = lstm_pallas(
        x_chunks,
        params["w_ih0_t"], params["b0"],
        params["w_hh0_t"].astype(jnp.bfloat16),
        params["w_ih1_t"].astype(jnp.bfloat16),
        params["w_hh1_t"].astype(jnp.bfloat16),
        params["b1"],
        hidden_size=H, batch=B, t_chunk=tc)                          # (n_chunks, B, Tc*H)

    # Unpack the lane-packed output -> (T, B, H).
    h1_tm = packed.reshape(n_chunks, B, tc, H).transpose(0, 2, 1, 3).reshape(T_pad, B, H)[:T]

    # pad_packed_sequence zero-pads padded positions: mask once, lane-dense, outside the kernel.
    mask_tm = (jnp.arange(T)[:, None] < lengths[None, :].astype(jnp.int32))[:, :, None]
    h1_tm = jnp.where(mask_tm, h1_tm, 0.0)

    # Dropout(0.3) is identity in eval mode.
    # Linear head outside the kernel: one lane-dense matmul instead of T tiny (B,H)@(H,4) ones.
    y = (h1_tm.reshape(T * B, H) @ params["w_out_t"]
         + params["b_out"]).reshape(T, B, target_size)
    return jnp.transpose(y, (1, 0, 2))                               # (B, T, target_size)


# ------------------------- Pure-JAX f32 reference for validation -------------------------

def lstm_reference(data, lengths, params, *, hidden_size, target_size):
    B, T, F = data.shape
    H = hidden_size
    icd9 = data[:, :, -1].astype(jnp.int32)
    feats = jnp.concatenate([data[:, :, :-1], jnp.take(params["embedding"], icd9, axis=0)], axis=-1)
    x_tm = jnp.transpose(feats, (1, 0, 2))
    mask_tm = (jnp.arange(T)[:, None] < lengths[None, :]).astype(jnp.float32)[:, :, None]

    def gates_to_hc(g, c):
        i = jax.nn.sigmoid(g[:, 0 * H:1 * H])
        f = jax.nn.sigmoid(g[:, 1 * H:2 * H])
        gg = jnp.tanh(g[:, 2 * H:3 * H])
        o = jax.nn.sigmoid(g[:, 3 * H:4 * H])
        cn = f * c + i * gg
        hn = o * jnp.tanh(cn)
        return hn, cn

    def step(carry, inp):
        h0, c0, h1, c1 = carry
        x_t, m = inp
        g0 = x_t @ params["w_ih0_t"] + h0 @ params["w_hh0_t"] + params["b0"]
        h0n, c0n = gates_to_hc(g0, c0)
        h0 = m * h0n + (1 - m) * h0
        c0 = m * c0n + (1 - m) * c0
        g1 = h0 @ params["w_ih1_t"] + h1 @ params["w_hh1_t"] + params["b1"]
        h1n, c1n = gates_to_hc(g1, c1)
        h1 = m * h1n + (1 - m) * h1
        c1 = m * c1n + (1 - m) * c1
        y = (m * h1) @ params["w_out_t"] + params["b_out"]
        return (h0, c0, h1, c1), y

    z = jnp.zeros((B, H), jnp.float32)
    _, y_tm = jax.lax.scan(step, (z, z, z, z), (x_tm, mask_tm))
    return jnp.transpose(y_tm, (1, 0, 2))


# ------------------------- Main -------------------------

if __name__ == "__main__":
    # Small config consistent with the module:
    #   data_shape[0] = F = 13  -> LSTM input size = 12 + 64 = 76
    B, T, F = 2, 8, 13
    ICD9_EMB = 100
    HIDDEN = 32
    TARGET = 4

    key = jax.random.PRNGKey(0)
    k_data, k_icd, k_params = jax.random.split(key, 3)

    cont = jax.random.normal(k_data, (B, T, F - 1), jnp.float32)
    icd9_codes = jax.random.randint(k_icd, (B, T), 0, ICD9_EMB + 1).astype(jnp.float32)
    data = jnp.concatenate([cont, icd9_codes[:, :, None]], axis=-1)   # (B, T, F)
    lengths = jnp.array([8, 5], dtype=jnp.int32)

    params = init_params(k_params, feat_dim=F, icd9_embeddings=ICD9_EMB,
                         emb_dim=64, hidden_size=HIDDEN, target_size=TARGET)

    out = lstm_forward(data, lengths, params, hidden_size=HIDDEN, target_size=TARGET)
    out = jax.block_until_ready(out)

    ref = lstm_reference(data, lengths, params, hidden_size=HIDDEN, target_size=TARGET)
    assert out.shape == (B, T, TARGET)
    # Tolerance loosened vs the pure-f32 version: recurrent matmuls use bf16 MXU operands
    # with f32 accumulation.
    assert jnp.max(jnp.abs(out - ref)) < 3e-2, float(jnp.max(jnp.abs(out - ref)))

    print("KERNEL_OK")
</pallas_src>

<mosaic_0001>
module attributes {stable_mosaic.version = 11 : i64} {
  func.func @_lstm_kernel(%arg0: i32, %arg1: memref<1x16x76xf32, #tpu.memory_space<vmem>>, %arg2: memref<76x128xf32, #tpu.memory_space<vmem>>, %arg3: memref<1x128xf32, #tpu.memory_space<vmem>>, %arg4: memref<32x128xbf16, #tpu.memory_space<vmem>>, %arg5: memref<32x128xbf16, #tpu.memory_space<vmem>>, %arg6: memref<32x128xbf16, #tpu.memory_space<vmem>>, %arg7: memref<1x128xf32, #tpu.memory_space<vmem>>, %arg8: memref<1x2x256xf32, #tpu.memory_space<vmem>>, %arg9: memref<4x2x32xf32, #tpu.memory_space<vmem>>) attributes {dimension_semantics = [#tpu.dimension_semantics<arbitrary>], iteration_bounds = array<i64: 1>, scalar_prefetch = 0 : i64, scratch_operands = 1 : i64, tpu.core_type = #tpu.core_type<tc>, window_params = [{transform_indices = @transform_0, window_bounds = array<i64: 1, 16, 76>}, {pipeline_mode = #tpu.pipeline_mode<synchronous>, transform_indices = @transform_1, window_bounds = array<i64: 76, 128>}, {pipeline_mode = #tpu.pipeline_mode<synchronous>, transform_indices = @transform_2, window_bounds = array<i64: 1, 128>}, {pipeline_mode = #tpu.pipeline_mode<synchronous>, transform_indices = @transform_3, window_bounds = array<i64: 32, 128>}, {pipeline_mode = #tpu.pipeline_mode<synchronous>, transform_indices = @transform_4, window_bounds = array<i64: 32, 128>}, {pipeline_mode = #tpu.pipeline_mode<synchronous>, transform_indices = @transform_5, window_bounds = array<i64: 32, 128>}, {pipeline_mode = #tpu.pipeline_mode<synchronous>, transform_indices = @transform_6, window_bounds = array<i64: 1, 128>}, {transform_indices = @transform_7, window_bounds = array<i64: 1, 2, 256>}]} {
    %c0_i32 = arith.constant 0 : i32
    %0 = arith.cmpi eq, %arg0, %c0_i32 : i32
    %1 = arith.extui %0 : i1 to i32
    %c0_i32_0 = arith.constant 0 : i32
    %2 = arith.cmpi ne, %1, %c0_i32_0 : i32
    scf.if %2 {
      %cst_79 = arith.constant 0.000000e+00 : f32
      %360 = vector.broadcast %cst_79 : f32 to vector<4x2x32xf32>
      %c0_80 = arith.constant 0 : index
      %c0_81 = arith.constant 0 : index
      %c0_82 = arith.constant 0 : index
      %361 = vector.load %arg9[%c0_80, %c0_81, %c0_82] : memref<4x2x32xf32, #tpu.memory_space<vmem>>, vector<4x2x32xf32>
      tpu.vector_store %arg9[%c0_80, %c0_81, %c0_82], %360 {strides = array<i32>} : memref<4x2x32xf32, #tpu.memory_space<vmem>>, vector<4x2x32xf32>,
    } else {
    }
    %c0 = arith.constant 0 : index
    %c0_1 = arith.constant 0 : index
    %c0_2 = arith.constant 0 : index
    %3 = vector.load %arg9[%c0, %c0_1, %c0_2] : memref<4x2x32xf32, #tpu.memory_space<vmem>>, vector<1x2x32xf32>
    %4 = vector.shape_cast %3 : vector<1x2x32xf32> to vector<2x32xf32>
    %c1 = arith.constant 1 : index
    %c0_3 = arith.constant 0 : index
    %c0_4 = arith.constant 0 : index
    %5 = vector.load %arg9[%c1, %c0_3, %c0_4] : memref<4x2x32xf32, #tpu.memory_space<vmem>>, vector<1x2x32xf32>
    %6 = vector.shape_cast %5 : vector<1x2x32xf32> to vector<2x32xf32>
    %c2 = arith.constant 2 : index
    %c0_5 = arith.constant 0 : index
    %c0_6 = arith.constant 0 : index
    %7 = vector.load %arg9[%c2, %c0_5, %c0_6] : memref<4x2x32xf32, #tpu.memory_space<vmem>>, vector<1x2x32xf32>
    %8 = vector.shape_cast %7 : vector<1x2x32xf32> to vector<2x32xf32>
    %c3 = arith.constant 3 : index
    %c0_7 = arith.constant 0 : index
    %c0_8 = arith.constant 0 : index
    %9 = vector.load %arg9[%c3, %c0_7, %c0_8] : memref<4x2x32xf32, #tpu.memory_space<vmem>>, vector<1x2x32xf32>
    %10 = vector.shape_cast %9 : vector<1x2x32xf32> to vector<2x32xf32>
    %c0_9 = arith.constant 0 : index
    %c0_10 = arith.constant 0 : index
    %11 = vector.load %arg4[%c0_9, %c0_10] : memref<32x128xbf16, #tpu.memory_space<vmem>>, vector<32x128xbf16>
    %c0_11 = arith.constant 0 : index
    %c0_12 = arith.constant 0 : index
    %12 = vector.load %arg5[%c0_11, %c0_12] : memref<32x128xbf16, #tpu.memory_space<vmem>>, vector<32x128xbf16>
    %c0_13 = arith.constant 0 : index
    %c0_14 = arith.constant 0 : index
    %13 = vector.load %arg6[%c0_13, %c0_14] : memref<32x128xbf16, #tpu.memory_space<vmem>>, vector<32x128xbf16>
    %c0_15 = arith.constant 0 : index
    %c0_16 = arith.constant 0 : index
    %14 = vector.load %arg7[%c0_15, %c0_16] : memref<1x128xf32, #tpu.memory_space<vmem>>, vector<1x128xf32>
    %15 = vector.shape_cast %14 : vector<1x128xf32> to vector<1x128xf32>
    %16 = vector.broadcast %15 : vector<1x128xf32> to vector<2x128xf32>
    %c0_17 = arith.constant 0 : index
    %c0_18 = arith.constant 0 : index
    %c0_19 = arith.constant 0 : index
    %17 = vector.load %arg1[%c0_17, %c0_18, %c0_19] : memref<1x16x76xf32, #tpu.memory_space<vmem>>, vector<1x16x76xf32>
    %18 = vector.shape_cast %17 : vector<1x16x76xf32> to vector<16x76xf32>
    %c0_20 = arith.constant 0 : index
    %c0_21 = arith.constant 0 : index
    %19 = vector.load %arg2[%c0_20, %c0_21] : memref<76x128xf32, #tpu.memory_space<vmem>>, vector<76x128xf32>
    %cst = arith.constant dense<0.000000e+00> : vector<16x128xf32>
    %20 = tpu.matmul %18, %19, %cst {dimension_numbers = #tpu.dot_dimension_numbers<[1], [0], [0], [1], [0, 0, 1, 1], [], []>} : vector<16x76xf32>, vector<76x128xf32>, vector<16x128xf32> -> vector<16x128xf32>
    %c0_22 = arith.constant 0 : index
    %c0_23 = arith.constant 0 : index
    %21 = vector.load %arg3[%c0_22, %c0_23] : memref<1x128xf32, #tpu.memory_space<vmem>>, vector<1x128xf32>
    %22 = vector.broadcast %21 : vector<1x128xf32> to vector<16x128xf32>
    %23 = arith.addf %20, %22 : vector<16x128xf32>
    %24 = vector.extract_strided_slice %23 {offsets = [0, 0], sizes = [2, 128], strides = [1, 1]} : vector<16x128xf32> to vector<2x128xf32>
    %25 = arith.truncf %4 : vector<2x32xf32> to vector<2x32xbf16>
    %cst_24 = arith.constant dense<0.000000e+00> : vector<2x128xf32>
    %26 = tpu.matmul %25, %11, %cst_24 {dimension_numbers = #tpu.dot_dimension_numbers<[1], [0], [0], [1], [0, 0, 1, 1], [], []>} : vector<2x32xbf16>, vector<32x128xbf16>, vector<2x128xf32> -> vector<2x128xf32>
    %27 = arith.addf %24, %26 : vector<2x128xf32>
    %28 = arith.negf %27 : vector<2x128xf32>
    %29 = math.exp %28 : vector<2x128xf32>
    %cst_25 = arith.constant 1.000000e+00 : f32
    %30 = vector.broadcast %cst_25 : f32 to vector<2x128xf32>
    %31 = arith.addf %30, %29 : vector<2x128xf32>
    %32 = arith.divf %30, %31 : vector<2x128xf32>
    %33 = vector.extract_strided_slice %27 {offsets = [0, 64], sizes = [2, 32], strides = [1, 1]} : vector<2x128xf32> to vector<2x32xf32>
    %34 = math.tanh %33 : vector<2x32xf32>
    %35 = vector.extract_strided_slice %32 {offsets = [0, 32], sizes = [2, 32], strides = [1, 1]} : vector<2x128xf32> to vector<2x32xf32>
    %36 = arith.mulf %35, %6 : vector<2x32xf32>
    %37 = vector.extract_strided_slice %32 {offsets = [0, 0], sizes = [2, 32], strides = [1, 1]} : vector<2x128xf32> to vector<2x32xf32>
    %38 = arith.mulf %37, %34 : vector<2x32xf32>
    %39 = arith.addf %36, %38 : vector<2x32xf32>
    %40 = vector.extract_strided_slice %32 {offsets = [0, 96], sizes = [2, 32], strides = [1, 1]} : vector<2x128xf32> to vector<2x32xf32>
    %41 = math.tanh %39 : vector<2x32xf32>
    %42 = arith.mulf %40, %41 : vector<2x32xf32>
    %43 = arith.truncf %42 : vector<2x32xf32> to vector<2x32xbf16>
    %cst_26 = arith.constant dense<0.000000e+00> : vector<2x128xf32>
    %44 = tpu.matmul %43, %12, %cst_26 {dimension_numbers = #tpu.dot_dimension_numbers<[1], [0], [0], [1], [0, 0, 1, 1], [], []>} : vector<2x32xbf16>, vector<32x128xbf16>, vector<2x128xf32> -> vector<2x128xf32>
    %45 = arith.truncf %8 : vector<2x32xf32> to vector<2x32xbf16>
    %cst_27 = arith.constant dense<0.000000e+00> : vector<2x128xf32>
    %46 = tpu.matmul %45, %13, %cst_27 {dimension_numbers = #tpu.dot_dimension_numbers<[1], [0], [0], [1], [0, 0, 1, 1], [], []>} : vector<2x32xbf16>, vector<32x128xbf16>, vector<2x128xf32> -> vector<2x128xf32>
    %47 = arith.addf %44, %46 : vector<2x128xf32>
    %48 = arith.addf %47, %16 : vector<2x128xf32>
    %49 = arith.negf %48 : vector<2x128xf32>
    %50 = math.exp %49 : vector<2x128xf32>
    %cst_28 = arith.constant 1.000000e+00 : f32
    %51 = vector.broadcast %cst_28 : f32 to vector<2x128xf32>
    %52 = arith.addf %51, %50 : vector<2x128xf32>
    %53 = arith.divf %51, %52 : vector<2x128xf32>
    %54 = vector.extract_strided_slice %48 {offsets = [0, 64], sizes = [2, 32], strides = [1, 1]} : vector<2x128xf32> to vector<2x32xf32>
    %55 = math.tanh %54 : vector<2x32xf32>
    %56 = vector.extract_strided_slice %53 {offsets = [0, 32], sizes = [2, 32], strides = [1, 1]} : vector<2x128xf32> to vector<2x32xf32>
    %57 = arith.mulf %56, %10 : vector<2x32xf32>
    %58 = vector.extract_strided_slice %53 {offsets = [0, 0], sizes = [2, 32], strides = [1, 1]} : vector<2x128xf32> to vector<2x32xf32>
    %59 = arith.mulf %58, %55 : vector<2x32xf32>
    %60 = arith.addf %57, %59 : vector<2x32xf32>
    %61 = vector.extract_strided_slice %53 {offsets = [0, 96], sizes = [2, 32], strides = [1, 1]} : vector<2x128xf32> to vector<2x32xf32>
    %62 = math.tanh %60 : vector<2x32xf32>
    %63 = arith.mulf %61, %62 : vector<2x32xf32>
    %64 = vector.extract_strided_slice %23 {offsets = [2, 0], sizes = [2, 128], strides = [1, 1]} : vector<16x128xf32> to vector<2x128xf32>
    %65 = arith.truncf %42 : vector<2x32xf32> to vector<2x32xbf16>
    %cst_29 = arith.constant dense<0.000000e+00> : vector<2x128xf32>
    %66 = tpu.matmul %65, %11, %cst_29 {dimension_numbers = #tpu.dot_dimension_numbers<[1], [0], [0], [1], [0, 0, 1, 1], [], []>} : vector<2x32xbf16>, vector<32x128xbf16>, vector<2x128xf32> -> vector<2x128xf32>
    %67 = arith.addf %64, %66 : vector<2x128xf32>
    %68 = arith.negf %67 : vector<2x128xf32>
    %69 = math.exp %68 : vector<2x128xf32>
    %cst_30 = arith.constant 1.000000e+00 : f32
    %70 = vector.broadcast %cst_30 : f32 to vector<2x128xf32>
    %71 = arith.addf %70, %69 : vector<2x128xf32>
    %72 = arith.divf %70, %71 : vector<2x128xf32>
    %73 = vector.extract_strided_slice %67 {offsets = [0, 64], sizes = [2, 32], strides = [1, 1]} : vector<2x128xf32> to vector<2x32xf32>
    %74 = math.tanh %73 : vector<2x32xf32>
    %75 = vector.extract_strided_slice %72 {offsets = [0, 32], sizes = [2, 32], strides = [1, 1]} : vector<2x128xf32> to vector<2x32xf32>
    %76 = arith.mulf %75, %39 : vector<2x32xf32>
    %77 = vector.extract_strided_slice %72 {offsets = [0, 0], sizes = [2, 32], strides = [1, 1]} : vector<2x128xf32> to vector<2x32xf32>
    %78 = arith.mulf %77, %74 : vector<2x32xf32>
    %79 = arith.addf %76, %78 : vector<2x32xf32>
    %80 = vector.extract_strided_slice %72 {offsets = [0, 96], sizes = [2, 32], strides = [1, 1]} : vector<2x128xf32> to vector<2x32xf32>
    %81 = math.tanh %79 : vector<2x32xf32>
    %82 = arith.mulf %80, %81 : vector<2x32xf32>
    %83 = arith.truncf %82 : vector<2x32xf32> to vector<2x32xbf16>
    %cst_31 = arith.constant dense<0.000000e+00> : vector<2x128xf32>
    %84 = tpu.matmul %83, %12, %cst_31 {dimension_numbers = #tpu.dot_dimension_numbers<[1], [0], [0], [1], [0, 0, 1, 1], [], []>} : vector<2x32xbf16>, vector<32x128xbf16>, vector<2x128xf32> -> vector<2x128xf32>
    %85 = arith.truncf %63 : vector<2x32xf32> to vector<2x32xbf16>
    %cst_32 = arith.constant dense<0.000000e+00> : vector<2x128xf32>
    %86 = tpu.matmul %85, %13, %cst_32 {dimension_numbers = #tpu.dot_dimension_numbers<[1], [0], [0], [1], [0, 0, 1, 1], [], []>} : vector<2x32xbf16>, vector<32x128xbf16>, vector<2x128xf32> -> vector<2x128xf32>
    %87 = arith.addf %84, %86 : vector<2x128xf32>
    %88 = arith.addf %87, %16 : vector<2x128xf32>
    %89 = arith.negf %88 : vector<2x128xf32>
    %90 = math.exp %89 : vector<2x128xf32>
    %cst_33 = arith.constant 1.000000e+00 : f32
    %91 = vector.broadcast %cst_33 : f32 to vector<2x128xf32>
    %92 = arith.addf %91, %90 : vector<2x128xf32>
    %93 = arith.divf %91, %92 : vector<2x128xf32>
    %94 = vector.extract_strided_slice %88 {offsets = [0, 64], sizes = [2, 32], strides = [1, 1]} : vector<2x128xf32> to vector<2x32xf32>
    %95 = math.tanh %94 : vector<2x32xf32>
    %96 = vector.extract_strided_slice %93 {offsets = [0, 32], sizes = [2, 32], strides = [1, 1]} : vector<2x128xf32> to vector<2x32xf32>
    %97 = arith.mulf %96, %60 : vector<2x32xf32>
    %98 = vector.extract_strided_slice %93 {offsets = [0, 0], sizes = [2, 32], strides = [1, 1]} : vector<2x128xf32> to vector<2x32xf32>
    %99 = arith.mulf %98, %95 : vector<2x32xf32>
    %100 = arith.addf %97, %99 : vector<2x32xf32>
    %101 = vector.extract_strided_slice %93 {offsets = [0, 96], sizes = [2, 32], strides = [1, 1]} : vector<2x128xf32> to vector<2x32xf32>
    %102 = math.tanh %100 : vector<2x32xf32>
    %103 = arith.mulf %101, %102 : vector<2x32xf32>
    %104 = vector.extract_strided_slice %23 {offsets = [4, 0], sizes = [2, 128], strides = [1, 1]} : vector<16x128xf32> to vector<2x128xf32>
    %105 = arith.truncf %82 : vector<2x32xf32> to vector<2x32xbf16>
    %cst_34 = arith.constant dense<0.000000e+00> : vector<2x128xf32>
    %106 = tpu.matmul %105, %11, %cst_34 {dimension_numbers = #tpu.dot_dimension_numbers<[1], [0], [0], [1], [0, 0, 1, 1], [], []>} : vector<2x32xbf16>, vector<32x128xbf16>, vector<2x128xf32> -> vector<2x128xf32>
    %107 = arith.addf %104, %106 : vector<2x128xf32>
    %108 = arith.negf %107 : vector<2x128xf32>
    %109 = math.exp %108 : vector<2x128xf32>
    %cst_35 = arith.constant 1.000000e+00 : f32
    %110 = vector.broadcast %cst_35 : f32 to vector<2x128xf32>
    %111 = arith.addf %110, %109 : vector<2x128xf32>
    %112 = arith.divf %110, %111 : vector<2x128xf32>
    %113 = vector.extract_strided_slice %107 {offsets = [0, 64], sizes = [2, 32], strides = [1, 1]} : vector<2x128xf32> to vector<2x32xf32>
    %114 = math.tanh %113 : vector<2x32xf32>
    %115 = vector.extract_strided_slice %112 {offsets = [0, 32], sizes = [2, 32], strides = [1, 1]} : vector<2x128xf32> to vector<2x32xf32>
    %116 = arith.mulf %115, %79 : vector<2x32xf32>
    %117 = vector.extract_strided_slice %112 {offsets = [0, 0], sizes = [2, 32], strides = [1, 1]} : vector<2x128xf32> to vector<2x32xf32>
    %118 = arith.mulf %117, %114 : vector<2x32xf32>
    %119 = arith.addf %116, %118 : vector<2x32xf32>
    %120 = vector.extract_strided_slice %112 {offsets = [0, 96], sizes = [2, 32], strides = [1, 1]} : vector<2x128xf32> to vector<2x32xf32>
    %121 = math.tanh %119 : vector<2x32xf32>
    %122 = arith.mulf %120, %121 : vector<2x32xf32>
    %123 = arith.truncf %122 : vector<2x32xf32> to vector<2x32xbf16>
    %cst_36 = arith.constant dense<0.000000e+00> : vector<2x128xf32>
    %124 = tpu.matmul %123, %12, %cst_36 {dimension_numbers = #tpu.dot_dimension_numbers<[1], [0], [0], [1], [0, 0, 1, 1], [], []>} : vector<2x32xbf16>, vector<32x128xbf16>, vector<2x128xf32> -> vector<2x128xf32>
    %125 = arith.truncf %103 : vector<2x32xf32> to vector<2x32xbf16>
    %cst_37 = arith.constant dense<0.000000e+00> : vector<2x128xf32>
    %126 = tpu.matmul %125, %13, %cst_37 {dimension_numbers = #tpu.dot_dimension_numbers<[1], [0], [0], [1], [0, 0, 1, 1], [], []>} : vector<2x32xbf16>, vector<32x128xbf16>, vector<2x128xf32> -> vector<2x128xf32>
    %127 = arith.addf %124, %126 : vector<2x128xf32>
    %128 = arith.addf %127, %16 : vector<2x128xf32>
    %129 = arith.negf %128 : vector<2x128xf32>
    %130 = math.exp %129 : vector<2x128xf32>
    %cst_38 = arith.constant 1.000000e+00 : f32
    %131 = vector.broadcast %cst_38 : f32 to vector<2x128xf32>
    %132 = arith.addf %131, %130 : vector<2x128xf32>
    %133 = arith.divf %131, %132 : vector<2x128xf32>
    %134 = vector.extract_strided_slice %128 {offsets = [0, 64], sizes = [2, 32], strides = [1, 1]} : vector<2x128xf32> to vector<2x32xf32>
    %135 = math.tanh %134 : vector<2x32xf32>
    %136 = vector.extract_strided_slice %133 {offsets = [0, 32], sizes = [2, 32], strides = [1, 1]} : vector<2x128xf32> to vector<2x32xf32>
    %137 = arith.mulf %136, %100 : vector<2x32xf32>
    %138 = vector.extract_strided_slice %133 {offsets = [0, 0], sizes = [2, 32], strides = [1, 1]} : vector<2x128xf32> to vector<2x32xf32>
    %139 = arith.mulf %138, %135 : vector<2x32xf32>
    %140 = arith.addf %137, %139 : vector<2x32xf32>
    %141 = vector.extract_strided_slice %133 {offsets = [0, 96], sizes = [2, 32], strides = [1, 1]} : vector<2x128xf32> to vector<2x32xf32>
    %142 = math.tanh %140 : vector<2x32xf32>
    %143 = arith.mulf %141, %142 : vector<2x32xf32>
    %144 = vector.extract_strided_slice %23 {offsets = [6, 0], sizes = [2, 128], strides = [1, 1]} : vector<16x128xf32> to vector<2x128xf32>
    %145 = arith.truncf %122 : vector<2x32xf32> to vector<2x32xbf16>
    %cst_39 = arith.constant dense<0.000000e+00> : vector<2x128xf32>
    %146 = tpu.matmul %145, %11, %cst_39 {dimension_numbers = #tpu.dot_dimension_numbers<[1], [0], [0], [1], [0, 0, 1, 1], [], []>} : vector<2x32xbf16>, vector<32x128xbf16>, vector<2x128xf32> -> vector<2x128xf32>
    %147 = arith.addf %144, %146 : vector<2x128xf32>
    %148 = arith.negf %147 : vector<2x128xf32>
    %149 = math.exp %148 : vector<2x128xf32>
    %cst_40 = arith.constant 1.000000e+00 : f32
    %150 = vector.broadcast %cst_40 : f32 to vector<2x128xf32>
    %151 = arith.addf %150, %149 : vector<2x128xf32>
    %152 = arith.divf %150, %151 : vector<2x128xf32>
    %153 = vector.extract_strided_slice %147 {offsets = [0, 64], sizes = [2, 32], strides = [1, 1]} : vector<2x128xf32> to vector<2x32xf32>
    %154 = math.tanh %153 : vector<2x32xf32>
    %155 = vector.extract_strided_slice %152 {offsets = [0, 32], sizes = [2, 32], strides = [1, 1]} : vector<2x128xf32> to vector<2x32xf32>
    %156 = arith.mulf %155, %119 : vector<2x32xf32>
    %157 = vector.extract_strided_slice %152 {offsets = [0, 0], sizes = [2, 32], strides = [1, 1]} : vector<2x128xf32> to vector<2x32xf32>
    %158 = arith.mulf %157, %154 : vector<2x32xf32>
    %159 = arith.addf %156, %158 : vector<2x32xf32>
    %160 = vector.extract_strided_slice %152 {offsets = [0, 96], sizes = [2, 32], strides = [1, 1]} : vector<2x128xf32> to vector<2x32xf32>
    %161 = math.tanh %159 : vector<2x32xf32>
    %162 = arith.mulf %160, %161 : vector<2x32xf32>
    %163 = arith.truncf %162 : vector<2x32xf32> to vector<2x32xbf16>
    %cst_41 = arith.constant dense<0.000000e+00> : vector<2x128xf32>
    %164 = tpu.matmul %163, %12, %cst_41 {dimension_numbers = #tpu.dot_dimension_numbers<[1], [0], [0], [1], [0, 0, 1, 1], [], []>} : vector<2x32xbf16>, vector<32x128xbf16>, vector<2x128xf32> -> vector<2x128xf32>
    %165 = arith.truncf %143 : vector<2x32xf32> to vector<2x32xbf16>
    %cst_42 = arith.constant dense<0.000000e+00> : vector<2x128xf32>
    %166 = tpu.matmul %165, %13, %cst_42 {dimension_numbers = #tpu.dot_dimension_numbers<[1], [0], [0], [1], [0, 0, 1, 1], [], []>} : vector<2x32xbf16>, vector<32x128xbf16>, vector<2x128xf32> -> vector<2x128xf32>
    %167 = arith.addf %164, %166 : vector<2x128xf32>
    %168 = arith.addf %167, %16 : vector<2x128xf32>
    %169 = arith.negf %168 : vector<2x128xf32>
    %170 = math.exp %169 : vector<2x128xf32>
    %cst_43 = arith.constant 1.000000e+00 : f32
    %171 = vector.broadcast %cst_43 : f32 to vector<2x128xf32>
    %172 = arith.addf %171, %170 : vector<2x128xf32>
    %173 = arith.divf %171, %172 : vector<2x128xf32>
    %174 = vector.extract_strided_slice %168 {offsets = [0, 64], sizes = [2, 32], strides = [1, 1]} : vector<2x128xf32> to vector<2x32xf32>
    %175 = math.tanh %174 : vector<2x32xf32>
    %176 = vector.extract_strided_slice %173 {offsets = [0, 32], sizes = [2, 32], strides = [1, 1]} : vector<2x128xf32> to vector<2x32xf32>
    %177 = arith.mulf %176, %140 : vector<2x32xf32>
    %178 = vector.extract_strided_slice %173 {offsets = [0, 0], sizes = [2, 32], strides = [1, 1]} : vector<2x128xf32> to vector<2x32xf32>
    %179 = arith.mulf %178, %175 : vector<2x32xf32>
    %180 = arith.addf %177, %179 : vector<2x32xf32>
    %181 = vector.extract_strided_slice %173 {offsets = [0, 96], sizes = [2, 32], strides = [1, 1]} : vector<2x128xf32> to vector<2x32xf32>
    %182 = math.tanh %180 : vector<2x32xf32>
    %183 = arith.mulf %181, %182 : vector<2x32xf32>
    %184 = vector.extract_strided_slice %23 {offsets = [8, 0], sizes = [2, 128], strides = [1, 1]} : vector<16x128xf32> to vector<2x128xf32>
    %185 = arith.truncf %162 : vector<2x32xf32> to vector<2x32xbf16>
    %cst_44 = arith.constant dense<0.000000e+00> : vector<2x128xf32>
    %186 = tpu.matmul %185, %11, %cst_44 {dimension_numbers = #tpu.dot_dimension_numbers<[1], [0], [0], [1], [0, 0, 1, 1], [], []>} : vector<2x32xbf16>, vector<32x128xbf16>, vector<2x128xf32> -> vector<2x128xf32>
    %187 = arith.addf %184, %186 : vector<2x128xf32>
    %188 = arith.negf %187 : vector<2x128xf32>
    %189 = math.exp %188 : vector<2x128xf32>
    %cst_45 = arith.constant 1.000000e+00 : f32
    %190 = vector.broadcast %cst_45 : f32 to vector<2x128xf32>
    %191 = arith.addf %190, %189 : vector<2x128xf32>
    %192 = arith.divf %190, %191 : vector<2x128xf32>
    %193 = vector.extract_strided_slice %187 {offsets = [0, 64], sizes = [2, 32], strides = [1, 1]} : vector<2x128xf32> to vector<2x32xf32>
    %194 = math.tanh %193 : vector<2x32xf32>
    %195 = vector.extract_strided_slice %192 {offsets = [0, 32], sizes = [2, 32], strides = [1, 1]} : vector<2x128xf32> to vector<2x32xf32>
    %196 = arith.mulf %195, %159 : vector<2x32xf32>
    %197 = vector.extract_strided_slice %192 {offsets = [0, 0], sizes = [2, 32], strides = [1, 1]} : vector<2x128xf32> to vector<2x32xf32>
    %198 = arith.mulf %197, %194 : vector<2x32xf32>
    %199 = arith.addf %196, %198 : vector<2x32xf32>
    %200 = vector.extract_strided_slice %192 {offsets = [0, 96], sizes = [2, 32], strides = [1, 1]} : vector<2x128xf32> to vector<2x32xf32>
    %201 = math.tanh %199 : vector<2x32xf32>
    %202 = arith.mulf %200, %201 : vector<2x32xf32>
    %203 = arith.truncf %202 : vector<2x32xf32> to vector<2x32xbf16>
    %cst_46 = arith.constant dense<0.000000e+00> : vector<2x128xf32>
    %204 = tpu.matmul %203, %12, %cst_46 {dimension_numbers = #tpu.dot_dimension_numbers<[1], [0], [0], [1], [0, 0, 1, 1], [], []>} : vector<2x32xbf16>, vector<32x128xbf16>, vector<2x128xf32> -> vector<2x128xf32>
    %205 = arith.truncf %183 : vector<2x32xf32> to vector<2x32xbf16>
    %cst_47 = arith.constant dense<0.000000e+00> : vector<2x128xf32>
    %206 = tpu.matmul %205, %13, %cst_47 {dimension_numbers = #tpu.dot_dimension_numbers<[1], [0], [0], [1], [0, 0, 1, 1], [], []>} : vector<2x32xbf16>, vector<32x128xbf16>, vector<2x128xf32> -> vector<2x128xf32>
    %207 = arith.addf %204, %206 : vector<2x128xf32>
    %208 = arith.addf %207, %16 : vector<2x128xf32>
    %209 = arith.negf %208 : vector<2x128xf32>
    %210 = math.exp %209 : vector<2x128xf32>
    %cst_48 = arith.constant 1.000000e+00 : f32
    %211 = vector.broadcast %cst_48 : f32 to vector<2x128xf32>
    %212 = arith.addf %211, %210 : vector<2x128xf32>
    %213 = arith.divf %211, %212 : vector<2x128xf32>
    %214 = vector.extract_strided_slice %208 {offsets = [0, 64], sizes = [2, 32], strides = [1, 1]} : vector<2x128xf32> to vector<2x32xf32>
    %215 = math.tanh %214 : vector<2x32xf32>
    %216 = vector.extract_strided_slice %213 {offsets = [0, 32], sizes = [2, 32], strides = [1, 1]} : vector<2x128xf32> to vector<2x32xf32>
    %217 = arith.mulf %216, %180 : vector<2x32xf32>
    %218 = vector.extract_strided_slice %213 {offsets = [0, 0], sizes = [2, 32], strides = [1, 1]} : vector<2x128xf32> to vector<2x32xf32>
    %219 = arith.mulf %218, %215 : vector<2x32xf32>
    %220 = arith.addf %217, %219 : vector<2x32xf32>
    %221 = vector.extract_strided_slice %213 {offsets = [0, 96], sizes = [2, 32], strides = [1, 1]} : vector<2x128xf32> to vector<2x32xf32>
    %222 = math.tanh %220 : vector<2x32xf32>
    %223 = arith.mulf %221, %222 : vector<2x32xf32>
    %224 = vector.extract_strided_slice %23 {offsets = [10, 0], sizes = [2, 128], strides = [1, 1]} : vector<16x128xf32> to vector<2x128xf32>
    %225 = arith.truncf %202 : vector<2x32xf32> to vector<2x32xbf16>
    %cst_49 = arith.constant dense<0.000000e+00> : vector<2x128xf32>
    %226 = tpu.matmul %225, %11, %cst_49 {dimension_numbers = #tpu.dot_dimension_numbers<[1], [0], [0], [1], [0, 0, 1, 1], [], []>} : vector<2x32xbf16>, vector<32x128xbf16>, vector<2x128xf32> -> vector<2x128xf32>
    %227 = arith.addf %224, %226 : vector<2x128xf32>
    %228 = arith.negf %227 : vector<2x128xf32>
    %229 = math.exp %228 : vector<2x128xf32>
    %cst_50 = arith.constant 1.000000e+00 : f32
    %230 = vector.broadcast %cst_50 : f32 to vector<2x128xf32>
    %231 = arith.addf %230, %229 : vector<2x128xf32>
    %232 = arith.divf %230, %231 : vector<2x128xf32>
    %233 = vector.extract_strided_slice %227 {offsets = [0, 64], sizes = [2, 32], strides = [1, 1]} : vector<2x128xf32> to vector<2x32xf32>
    %234 = math.tanh %233 : vector<2x32xf32>
    %235 = vector.extract_strided_slice %232 {offsets = [0, 32], sizes = [2, 32], strides = [1, 1]} : vector<2x128xf32> to vector<2x32xf32>
    %236 = arith.mulf %235, %199 : vector<2x32xf32>
    %237 = vector.extract_strided_slice %232 {offsets = [0, 0], sizes = [2, 32], strides = [1, 1]} : vector<2x128xf32> to vector<2x32xf32>
    %238 = arith.mulf %237, %234 : vector<2x32xf32>
    %239 = arith.addf %236, %238 : vector<2x32xf32>
    %240 = vector.extract_strided_slice %232 {offsets = [0, 96], sizes = [2, 32], strides = [1, 1]} : vector<2x128xf32> to vector<2x32xf32>
    %241 = math.tanh %239 : vector<2x32xf32>
    %242 = arith.mulf %240, %241 : vector<2x32xf32>
    %243 = arith.truncf %242 : vector<2x32xf32> to vector<2x32xbf16>
    %cst_51 = arith.constant dense<0.000000e+00> : vector<2x128xf32>
    %244 = tpu.matmul %243, %12, %cst_51 {dimension_numbers = #tpu.dot_dimension_numbers<[1], [0], [0], [1], [0, 0, 1, 1], [], []>} : vector<2x32xbf16>, vector<32x128xbf16>, vector<2x128xf32> -> vector<2x128xf32>
    %245 = arith.truncf %223 : vector<2x32xf32> to vector<2x32xbf16>
    %cst_52 = arith.constant dense<0.000000e+00> : vector<2x128xf32>
    %246 = tpu.matmul %245, %13, %cst_52 {dimension_numbers = #tpu.dot_dimension_numbers<[1], [0], [0], [1], [0, 0, 1, 1], [], []>} : vector<2x32xbf16>, vector<32x128xbf16>, vector<2x128xf32> -> vector<2x128xf32>
    %247 = arith.addf %244, %246 : vector<2x128xf32>
    %248 = arith.addf %247, %16 : vector<2x128xf32>
    %249 = arith.negf %248 : vector<2x128xf32>
    %250 = math.exp %249 : vector<2x128xf32>
    %cst_53 = arith.constant 1.000000e+00 : f32
    %251 = vector.broadcast %cst_53 : f32 to vector<2x128xf32>
    %252 = arith.addf %251, %250 : vector<2x128xf32>
    %253 = arith.divf %251, %252 : vector<2x128xf32>
    %254 = vector.extract_strided_slice %248 {offsets = [0, 64], sizes = [2, 32], strides = [1, 1]} : vector<2x128xf32> to vector<2x32xf32>
    %255 = math.tanh %254 : vector<2x32xf32>
    %256 = vector.extract_strided_slice %253 {offsets = [0, 32], sizes = [2, 32], strides = [1, 1]} : vector<2x128xf32> to vector<2x32xf32>
    %257 = arith.mulf %256, %220 : vector<2x32xf32>
    %258 = vector.extract_strided_slice %253 {offsets = [0, 0], sizes = [2, 32], strides = [1, 1]} : vector<2x128xf32> to vector<2x32xf32>
    %259 = arith.mulf %258, %255 : vector<2x32xf32>
    %260 = arith.addf %257, %259 : vector<2x32xf32>
    %261 = vector.extract_strided_slice %253 {offsets = [0, 96], sizes = [2, 32], strides = [1, 1]} : vector<2x128xf32> to vector<2x32xf32>
    %262 = math.tanh %260 : vector<2x32xf32>
    %263 = arith.mulf %261, %262 : vector<2x32xf32>
    %264 = vector.extract_strided_slice %23 {offsets = [12, 0], sizes = [2, 128], strides = [1, 1]} : vector<16x128xf32> to vector<2x128xf32>
    %265 = arith.truncf %242 : vector<2x32xf32> to vector<2x32xbf16>
    %cst_54 = arith.constant dense<0.000000e+00> : vector<2x128xf32>
    %266 = tpu.matmul %265, %11, %cst_54 {dimension_numbers = #tpu.dot_dimension_numbers<[1], [0], [0], [1], [0, 0, 1, 1], [], []>} : vector<2x32xbf16>, vector<32x128xbf16>, vector<2x128xf32> -> vector<2x128xf32>
    %267 = arith.addf %264, %266 : vector<2x128xf32>
    %268 = arith.negf %267 : vector<2x128xf32>
    %269 = math.exp %268 : vector<2x128xf32>
    %cst_55 = arith.constant 1.000000e+00 : f32
    %270 = vector.broadcast %cst_55 : f32 to vector<2x128xf32>
    %271 = arith.addf %270, %269 : vector<2x128xf32>
    %272 = arith.divf %270, %271 : vector<2x128xf32>
    %273 = vector.extract_strided_slice %267 {offsets = [0, 64], sizes = [2, 32], strides = [1, 1]} : vector<2x128xf32> to vector<2x32xf32>
    %274 = math.tanh %273 : vector<2x32xf32>
    %275 = vector.extract_strided_slice %272 {offsets = [0, 32], sizes = [2, 32], strides = [1, 1]} : vector<2x128xf32> to vector<2x32xf32>
    %276 = arith.mulf %275, %239 : vector<2x32xf32>
    %277 = vector.extract_strided_slice %272 {offsets = [0, 0], sizes = [2, 32], strides = [1, 1]} : vector<2x128xf32> to vector<2x32xf32>
    %278 = arith.mulf %277, %274 : vector<2x32xf32>
    %279 = arith.addf %276, %278 : vector<2x32xf32>
    %280 = vector.extract_strided_slice %272 {offsets = [0, 96], sizes = [2, 32], strides = [1, 1]} : vector<2x128xf32> to vector<2x32xf32>
    %281 = math.tanh %279 : vector<2x32xf32>
    %282 = arith.mulf %280, %281 : vector<2x32xf32>
    %283 = arith.truncf %282 : vector<2x32xf32> to vector<2x32xbf16>
    %cst_56 = arith.constant dense<0.000000e+00> : vector<2x128xf32>
    %284 = tpu.matmul %283, %12, %cst_56 {dimension_numbers = #tpu.dot_dimension_numbers<[1], [0], [0], [1], [0, 0, 1, 1], [], []>} : vector<2x32xbf16>, vector<32x128xbf16>, vector<2x128xf32> -> vector<2x128xf32>
    %285 = arith.truncf %263 : vector<2x32xf32> to vector<2x32xbf16>
    %cst_57 = arith.constant dense<0.000000e+00> : vector<2x128xf32>
    %286 = tpu.matmul %285, %13, %cst_57 {dimension_numbers = #tpu.dot_dimension_numbers<[1], [0], [0], [1], [0, 0, 1, 1], [], []>} : vector<2x32xbf16>, vector<32x128xbf16>, vector<2x128xf32> -> vector<2x128xf32>
    %287 = arith.addf %284, %286 : vector<2x128xf32>
    %288 = arith.addf %287, %16 : vector<2x128xf32>
    %289 = arith.negf %288 : vector<2x128xf32>
    %290 = math.exp %289 : vector<2x128xf32>
    %cst_58 = arith.constant 1.000000e+00 : f32
    %291 = vector.broadcast %cst_58 : f32 to vector<2x128xf32>
    %292 = arith.addf %291, %290 : vector<2x128xf32>
    %293 = arith.divf %291, %292 : vector<2x128xf32>
    %294 = vector.extract_strided_slice %288 {offsets = [0, 64], sizes = [2, 32], strides = [1, 1]} : vector<2x128xf32> to vector<2x32xf32>
    %295 = math.tanh %294 : vector<2x32xf32>
    %296 = vector.extract_strided_slice %293 {offsets = [0, 32], sizes = [2, 32], strides = [1, 1]} : vector<2x128xf32> to vector<2x32xf32>
    %297 = arith.mulf %296, %260 : vector<2x32xf32>
    %298 = vector.extract_strided_slice %293 {offsets = [0, 0], sizes = [2, 32], strides = [1, 1]} : vector<2x128xf32> to vector<2x32xf32>
    %299 = arith.mulf %298, %295 : vector<2x32xf32>
    %300 = arith.addf %297, %299 : vector<2x32xf32>
    %301 = vector.extract_strided_slice %293 {offsets = [0, 96], sizes = [2, 32], strides = [1, 1]} : vector<2x128xf32> to vector<2x32xf32>
    %302 = math.tanh %300 : vector<2x32xf32>
    %303 = arith.mulf %301, %302 : vector<2x32xf32>
    %304 = vector.extract_strided_slice %23 {offsets = [14, 0], sizes = [2, 128], strides = [1, 1]} : vector<16x128xf32> to vector<2x128xf32>
    %305 = arith.truncf %282 : vector<2x32xf32> to vector<2x32xbf16>
    %cst_59 = arith.constant dense<0.000000e+00> : vector<2x128xf32>
    %306 = tpu.matmul %305, %11, %cst_59 {dimension_numbers = #tpu.dot_dimension_numbers<[1], [0], [0], [1], [0, 0, 1, 1], [], []>} : vector<2x32xbf16>, vector<32x128xbf16>, vector<2x128xf32> -> vector<2x128xf32>
    %307 = arith.addf %304, %306 : vector<2x128xf32>
    %308 = arith.negf %307 : vector<2x128xf32>
    %309 = math.exp %308 : vector<2x128xf32>
    %cst_60 = arith.constant 1.000000e+00 : f32
    %310 = vector.broadcast %cst_60 : f32 to vector<2x128xf32>
    %311 = arith.addf %310, %309 : vector<2x128xf32>
    %312 = arith.divf %310, %311 : vector<2x128xf32>
    %313 = vector.extract_strided_slice %307 {offsets = [0, 64], sizes = [2, 32], strides = [1, 1]} : vector<2x128xf32> to vector<2x32xf32>
    %314 = math.tanh %313 : vector<2x32xf32>
    %315 = vector.extract_strided_slice %312 {offsets = [0, 32], sizes = [2, 32], strides = [1, 1]} : vector<2x128xf32> to vector<2x32xf32>
    %316 = arith.mulf %315, %279 : vector<2x32xf32>
    %317 = vector.extract_strided_slice %312 {offsets = [0, 0], sizes = [2, 32], strides = [1, 1]} : vector<2x128xf32> to vector<2x32xf32>
    %318 = arith.mulf %317, %314 : vector<2x32xf32>
    %319 = arith.addf %316, %318 : vector<2x32xf32>
    %320 = vector.extract_strided_slice %312 {offsets = [0, 96], sizes = [2, 32], strides = [1, 1]} : vector<2x128xf32> to vector<2x32xf32>
    %321 = math.tanh %319 : vector<2x32xf32>
    %322 = arith.mulf %320, %321 : vector<2x32xf32>
    %323 = arith.truncf %322 : vector<2x32xf32> to vector<2x32xbf16>
    %cst_61 = arith.constant dense<0.000000e+00> : vector<2x128xf32>
    %324 = tpu.matmul %323, %12, %cst_61 {dimension_numbers = #tpu.dot_dimension_numbers<[1], [0], [0], [1], [0, 0, 1, 1], [], []>} : vector<2x32xbf16>, vector<32x128xbf16>, vector<2x128xf32> -> vector<2x128xf32>
    %325 = arith.truncf %303 : vector<2x32xf32> to vector<2x32xbf16>
    %cst_62 = arith.constant dense<0.000000e+00> : vector<2x128xf32>
    %326 = tpu.matmul %325, %13, %cst_62 {dimension_numbers = #tpu.dot_dimension_numbers<[1], [0], [0], [1], [0, 0, 1, 1], [], []>} : vector<2x32xbf16>, vector<32x128xbf16>, vector<2x128xf32> -> vector<2x128xf32>
    %327 = arith.addf %324, %326 : vector<2x128xf32>
    %328 = arith.addf %327, %16 : vector<2x128xf32>
    %329 = arith.negf %328 : vector<2x128xf32>
    %330 = math.exp %329 : vector<2x128xf32>
    %cst_63 = arith.constant 1.000000e+00 : f32
    %331 = vector.broadcast %cst_63 : f32 to vector<2x128xf32>
    %332 = arith.addf %331, %330 : vector<2x128xf32>
    %333 = arith.divf %331, %332 : vector<2x128xf32>
    %334 = vector.extract_strided_slice %328 {offsets = [0, 64], sizes = [2, 32], strides = [1, 1]} : vector<2x128xf32> to vector<2x32xf32>
    %335 = math.tanh %334 : vector<2x32xf32>
    %336 = vector.extract_strided_slice %333 {offsets = [0, 32], sizes = [2, 32], strides = [1, 1]} : vector<2x128xf32> to vector<2x32xf32>
    %337 = arith.mulf %336, %300 : vector<2x32xf32>
    %338 = vector.extract_strided_slice %333 {offsets = [0, 0], sizes = [2, 32], strides = [1, 1]} : vector<2x128xf32> to vector<2x32xf32>
    %339 = arith.mulf %338, %335 : vector<2x32xf32>
    %340 = arith.addf %337, %339 : vector<2x32xf32>
    %341 = vector.extract_strided_slice %333 {offsets = [0, 96], sizes = [2, 32], strides = [1, 1]} : vector<2x128xf32> to vector<2x32xf32>
    %342 = math.tanh %340 : vector<2x32xf32>
    %343 = arith.mulf %341, %342 : vector<2x32xf32>
    %344 = tpu.concatenate %63, %103, %143, %183, %223, %263, %303, %343 in 1 : vector<2x32xf32>, vector<2x32xf32>, vector<2x32xf32>, vector<2x32xf32>, vector<2x32xf32>, vector<2x32xf32>, vector<2x32xf32>, vector<2x32xf32> -> vector<2x256xf32>
    %c0_64 = arith.constant 0 : index
    %c0_65 = arith.constant 0 : index
    %c0_66 = arith.constant 0 : index
    %345 = vector.load %arg8[%c0_64, %c0_65, %c0_66] : memref<1x2x256xf32, #tpu.memory_space<vmem>>, vector<1x2x256xf32>
    %346 = vector.shape_cast %345 : vector<1x2x256xf32> to vector<2x256xf32>
    %347 = vector.shape_cast %344 : vector<2x256xf32> to vector<1x2x256xf32>
    tpu.vector_store %arg8[%c0_64, %c0_65, %c0_66], %347 {strides = array<i32>} : memref<1x2x256xf32, #tpu.memory_space<vmem>>, vector<1x2x256xf32>,
    %c0_67 = arith.constant 0 : index
    %c0_68 = arith.constant 0 : index
    %c0_69 = arith.constant 0 : index
    %348 = vector.load %arg9[%c0_67, %c0_68, %c0_69] : memref<4x2x32xf32, #tpu.memory_space<vmem>>, vector<1x2x32xf32>
    %349 = vector.shape_cast %348 : vector<1x2x32xf32> to vector<2x32xf32>
    %350 = vector.shape_cast %322 : vector<2x32xf32> to vector<1x2x32xf32>
    tpu.vector_store %arg9[%c0_67, %c0_68, %c0_69], %350 {strides = array<i32>} : memref<4x2x32xf32, #tpu.memory_space<vmem>>, vector<1x2x32xf32>,
    %c1_70 = arith.constant 1 : index
    %c0_71 = arith.constant 0 : index
    %c0_72 = arith.constant 0 : index
    %351 = vector.load %arg9[%c1_70, %c0_71, %c0_72] : memref<4x2x32xf32, #tpu.memory_space<vmem>>, vector<1x2x32xf32>
    %352 = vector.shape_cast %351 : vector<1x2x32xf32> to vector<2x32xf32>
    %353 = vector.shape_cast %319 : vector<2x32xf32> to vector<1x2x32xf32>
    tpu.vector_store %arg9[%c1_70, %c0_71, %c0_72], %353 {strides = array<i32>} : memref<4x2x32xf32, #tpu.memory_space<vmem>>, vector<1x2x32xf32>,
    %c2_73 = arith.constant 2 : index
    %c0_74 = arith.constant 0 : index
    %c0_75 = arith.constant 0 : index
    %354 = vector.load %arg9[%c2_73, %c0_74, %c0_75] : memref<4x2x32xf32, #tpu.memory_space<vmem>>, vector<1x2x32xf32>
    %355 = vector.shape_cast %354 : vector<1x2x32xf32> to vector<2x32xf32>
    %356 = vector.shape_cast %343 : vector<2x32xf32> to vector<1x2x32xf32>
    tpu.vector_store %arg9[%c2_73, %c0_74, %c0_75], %356 {strides = array<i32>} : memref<4x2x32xf32, #tpu.memory_space<vmem>>, vector<1x2x32xf32>,
    %c3_76 = arith.constant 3 : index
    %c0_77 = arith.constant 0 : index
    %c0_78 = arith.constant 0 : index
    %357 = vector.load %arg9[%c3_76, %c0_77, %c0_78] : memref<4x2x32xf32, #tpu.memory_space<vmem>>, vector<1x2x32xf32>
    %358 = vector.shape_cast %357 : vector<1x2x32xf32> to vector<2x32xf32>
    %359 = vector.shape_cast %340 : vector<2x32xf32> to vector<1x2x32xf32>
    tpu.vector_store %arg9[%c3_76, %c0_77, %c0_78], %359 {strides = array<i32>} : memref<4x2x32xf32, #tpu.memory_space<vmem>>, vector<1x2x32xf32>,
    return
  }
  func.func @transform_0(%arg0: i32) -> (i32, i32, i32) {
    %c0_i32 = arith.constant 0 : i32
    %c0_i32_0 = arith.constant 0 : i32
    %c0_i32_1 = arith.constant 0 : i32
    return %arg0, %c0_i32, %c0_i32_0 : i32, i32, i32
  }
  func.func @transform_1(%arg0: i32) -> (i32, i32) {
    %c0_i32 = arith.constant 0 : i32
    %c0_i32_0 = arith.constant 0 : i32
    %c0_i32_1 = arith.constant 0 : i32
    return %c0_i32, %c0_i32_0 : i32, i32
  }
  func.func @transform_2(%arg0: i32) -> (i32, i32) {
    %c0_i32 = arith.constant 0 : i32
    %c0_i32_0 = arith.constant 0 : i32
    %c0_i32_1 = arith.constant 0 : i32
    return %c0_i32, %c0_i32_0 : i32, i32
  }
  func.func @transform_3(%arg0: i32) -> (i32, i32) {
    %c0_i32 = arith.constant 0 : i32
    %c0_i32_0 = arith.constant 0 : i32
    %c0_i32_1 = arith.constant 0 : i32
    return %c0_i32, %c0_i32_0 : i32, i32
  }
  func.func @transform_4(%arg0: i32) -> (i32, i32) {
    %c0_i32 = arith.constant 0 : i32
    %c0_i32_0 = arith.constant 0 : i32
    %c0_i32_1 = arith.constant 0 : i32
    return %c0_i32, %c0_i32_0 : i32, i32
  }
  func.func @transform_5(%arg0: i32) -> (i32, i32) {
    %c0_i32 = arith.constant 0 : i32
    %c0_i32_0 = arith.constant 0 : i32
    %c0_i32_1 = arith.constant 0 : i32
    return %c0_i32, %c0_i32_0 : i32, i32
  }
  func.func @transform_6(%arg0: i32) -> (i32, i32) {
    %c0_i32 = arith.constant 0 : i32
    %c0_i32_0 = arith.constant 0 : i32
    %c0_i32_1 = arith.constant 0 : i32
    return %c0_i32, %c0_i32_0 : i32, i32
  }
  func.func @transform_7(%arg0: i32) -> (i32, i32, i32) {
    %c0_i32 = arith.constant 0 : i32
    %c0_i32_0 = arith.constant 0 : i32
    %c0_i32_1 = arith.constant 0 : i32
    return %arg0, %c0_i32, %c0_i32_0 : i32, i32, i32
  }
}

</mosaic_0001>

<bundles_post_ra>
// kernel: tpu_custom_call.1
= control target key start
LH: loop header
LB: loop body
LE: loop exit
PB: predicated region body
PF: predicated region fallthrough
CT: control target
= control target key end

     0   :  { %12 = vsyncpa [#allocation4], 0  ;;  %s3025_s0 = inlined_call_operand.hbm [shape: f32[1,16,76], index: 0, kind: input, shape index: {}]   ;;  %s3026_s1 = inlined_call_operand.hbm [shape: f32[76,128], index: 1, kind: input, shape index: {}]   ;;  %s3027_s2 = inlined_call_operand.vmem [shape: f32[1,128], index: 2, kind: input, shape index: {}]   ;;  %s3028_s3 = inlined_call_operand.hbm [shape: bf16[32,128], index: 3, kind: input, shape index: {}]   ;;  %s3029_s4 = inlined_call_operand.hbm [shape: bf16[32,128], index: 4, kind: input, shape index: {}]   ;;  %s3030_s5 = inlined_call_operand.vmem [shape: bf16[32,128], index: 5, kind: input, shape index: {}]   ;;  %s3031_s6 = inlined_call_operand.vmem [shape: f32[1,128], index: 6, kind: input, shape index: {}]   ;;  %s3032_s7 = inlined_call_operand.hbm [shape: f32[1,2,256], index: 7, kind: output, shape index: {}]  }
   0x1   :  { %13 = vsyncpa [#allocation7], 0 }
   0x2   :  { %14 = vsyncpa [#allocation10], 0 }
   0x3   :  { %15 = vsyncpa [#allocation5], 0  ;;  %s2515_s24 = smov [#allocation6]   ;;  %s2516_s26 = smov [#allocation3]  }
   0x4   :  { %s33_s25 = sshll.u32 %s2515_s24, 4  ;;  %s21_s27 = sshll.u32 %s2516_s26, 4  ;;  %s34_s25 = int_to_ptr.vmem [resolvable:$true] %s33_s25  ;;  %s2569_s27 = int_to_ptr.vmem [resolvable:$true] %s21_s27 }
   0x5   :  { %s2397_s30 = scalar_lea.hbm %s3026_s1, 1280 }
   0x6   :  { %p2398_p0 = scmp.ne.s32.totalorder %s3026_s1, %s2397_s30  ;;  %p2401_p1 = scmp.lt.u32.totalorder %s2397_s30, %s3026_s1 }
   0x8   :  { %p2403_p2 = pnand %p2401_p1, %p2398_p0 }
   0xa   :  { %2406 = shalt.err (!%p2403_p2)
}
   0xb   :  { %s2407_s12 = scalar_lea.vmem %s34_s25, 1280  ;;  %p2412_p4 = scmp.lt.s32.totalorder %s34_s25, %s34_s25 }
   0xc   :  { %p2408_p3 = scmp.ne.s32.totalorder %s34_s25, %s2407_s12  ;;  %p2413_p5 = scmp.lt.s32.totalorder %s2407_s12, %s2407_s12 }
   0xe   :  { %p2414_p6 = por %p2413_p5, %p2412_p4 }
  0x10   :  { %p2415_p7 = pnand %p2414_p6, %p2408_p3 }
  0x12   :  { %2418 = shalt.err (!%p2415_p7)
}
  0x13   :  { %s2517_s13 = smov 128   ;;  %s2518_s14 = smov 8  }
  0x14   :  { %39 = dma.hbm_to_vmem [thread:$0]  %s3026_s1, 1280, %s34_s25, [#allocation7], %s2517_s13, %s2517_s13, %s2518_s14  }
  0x15   :  { %s2419_s19 = scalar_lea.hbm %s3025_s0, 256 }
  0x16   :  { %p2420_p8 = scmp.ne.s32.totalorder %s3025_s0, %s2419_s19  ;;  %p2423_p9 = scmp.lt.u32.totalorder %s2419_s19, %s3025_s0 }
  0x18   :  { %p2425_p10 = pnand %p2423_p9, %p2420_p8 }
  0x1a   :  { %2428 = shalt.err (!%p2425_p10)
}
  0x1b   :  { %s2429_s24 = scalar_lea.vmem %s2569_s27, 256  ;;  %p2434_p12 = scmp.lt.s32.totalorder %s2569_s27, %s2569_s27 }
  0x1c   :  { %p2430_p11 = scmp.ne.s32.totalorder %s2569_s27, %s2429_s24  ;;  %p2435_p13 = scmp.lt.s32.totalorder %s2429_s24, %s2429_s24 }
  0x1e   :  { %p2436_p0 = por %p2435_p13, %p2434_p12 }
  0x20   :  { %p2437_p1 = pnand %p2436_p0, %p2430_p11 }
  0x22   :  { %2440 = shalt.err (!%p2437_p1)
}
  0x23   :  { %27 = dma.hbm_to_vmem [thread:$0]  %s3025_s0, 256, %s2569_s27, [#allocation4], %s2517_s13, %s2517_s13, %s2518_s14  }
  0x24   :  { %s2519_s26 = smov [#allocation8]   ;;  %s2441_s8 = scalar_lea.hbm %s3028_s3, 256 }
  0x25   :  { %s47_s28 = sshll.u32 %s2519_s26, 4  ;;  %p2442_p2 = scmp.ne.s32.totalorder %s3028_s3, %s2441_s8  ;;  %s48_s28 = int_to_ptr.vmem [resolvable:$true] %s47_s28 }
  0x26   :  { %p2445_p3 = scmp.lt.u32.totalorder %s2441_s8, %s3028_s3 }
  0x28   :  { %p2447_p4 = pnand %p2445_p3, %p2442_p2 }
  0x2a   :  { %2450 = shalt.err (!%p2447_p4)
}
  0x2b   :  { %s2451_s15 = scalar_lea.vmem %s48_s28, 256  ;;  %p2456_p6 = scmp.lt.s32.totalorder %s48_s28, %s48_s28 }
  0x2c   :  { %p2452_p5 = scmp.ne.s32.totalorder %s48_s28, %s2451_s15  ;;  %p2457_p7 = scmp.lt.s32.totalorder %s2451_s15, %s2451_s15 }
  0x2e   :  { %p2458_p8 = por %p2457_p7, %p2456_p6 }
  0x30   :  { %p2459_p9 = pnand %p2458_p8, %p2452_p5 }
  0x32   :  { %2462 = shalt.err (!%p2459_p9)
}
  0x33   :  { %s2520_s0 = smov 64   ;;  %s2521_s27 = smov 4  }
  0x34   :  { %53 = dma.hbm_to_vmem [thread:$0]  %s3028_s3, 256, %s48_s28, [#allocation7], %s2520_s0, %s2520_s0, %s2521_s27  }
  0x35   :  { %s2522_s16 = smov [#allocation9]   ;;  %s2463_s20 = scalar_lea.hbm %s3029_s4, 256 }
  0x36   :  { %s59_s17 = sshll.u32 %s2522_s16, 4  ;;  %p2464_p10 = scmp.ne.s32.totalorder %s3029_s4, %s2463_s20  ;;  %s60_s17 = int_to_ptr.vmem [resolvable:$true] %s59_s17 }
  0x37   :  { %p2467_p11 = scmp.lt.u32.totalorder %s2463_s20, %s3029_s4 }
  0x39   :  { %p2469_p12 = pnand %p2467_p11, %p2464_p10 }
  0x3b   :  { %2472 = shalt.err (!%p2469_p12)
}
  0x3c   :  { %s2473_s1 = scalar_lea.vmem %s60_s17, 256  ;;  %p2478_p0 = scmp.lt.s32.totalorder %s60_s17, %s60_s17 }
  0x3d   :  { %p2474_p13 = scmp.ne.s32.totalorder %s60_s17, %s2473_s1  ;;  %p2479_p1 = scmp.lt.s32.totalorder %s2473_s1, %s2473_s1 }
  0x3f   :  { %p2480_p2 = por %p2479_p1, %p2478_p0 }
  0x41   :  { %p2481_p3 = pnand %p2480_p2, %p2474_p13 }
  0x43   :  { %2484 = shalt.err (!%p2481_p3)
}
  0x44   :  { %65 = dma.hbm_to_vmem [thread:$0]  %s3029_s4, 256, %s60_s17, [#allocation10], %s2520_s0, %s2520_s0, %s2521_s27  }
  0x45   :  { %2507 = dma.done.wait [#allocation4], 256  }
  0x46   :  { %2508 = vsyncadd [#allocation4], 4294967040 }
  0x47   :  { %2509 = dma.done.wait [#allocation7], 1536  }
  0x48   :  { %2510 = vsyncadd [#allocation7], 4294965760 }
  0x49   :  { %2511 = dma.done.wait [#allocation10], 256  }
  0x4a   :  { %2512 = vsyncadd [#allocation10], 4294967040  ;;  %v2523_v0 = vmov 0.0   ;;  %vm87_vm0 = vcmask 254976   ;;  %vm2524_vm1 = vmmov 0   ;;  %v120_v1 = vld [vmem:[#allocation6] sm:$0xff] }
  0x4b   :  { %2028 = vmatprep.subr.bf16.mxu1 %v2523_v0  ;;  %2032 = vmatprep.mubr.msk.bf16.mxu1 %vm2524_vm1, %v2523_v0  ;;  %88 = vst.msk [vmem:[#allocation2] sm:$0x3] %vm87_vm0, %v2523_v0  ;;  %89 = vst.msk [vmem:[#allocation2 + $0x2] sm:$0x3] %vm87_vm0, %v2523_v0  ;;  %v121_v2 = vld [vmem:[#allocation6 + $0x8] sm:$0xff]  ;;  %v122_v3 = vld [vmem:[#allocation6 + $0x10] sm:$0xff] }
  0x4c   :  { %90 = vst.msk [vmem:[#allocation2 + $0x4] sm:$0x3] %vm87_vm0, %v2523_v0  ;;  %91 = vst.msk [vmem:[#allocation2 + $0x6] sm:$0x3] %vm87_vm0, %v2523_v0  ;;  %v2220_v4 = vpack.c.bf16 %v121_v2, %v120_v1  ;;  %v123_v5 = vld [vmem:[#allocation6 + $0x18] sm:$0xff]  ;;  %v124_v7 = vld [vmem:[#allocation6 + $0x20] sm:$0xff] }
  0x4d   :  { %v2224_v6 = vpack.c.bf16 %v123_v5, %v122_v3  ;;  %v125_v8 = vld [vmem:[#allocation6 + $0x28] sm:$0xff]  ;;  %v2639_v9 = vld [vmem:[#allocation8] sm:$0xff]   ;;  %vm137_vm2 = vcmask 621568   ;;  %v127_v12 = vld [vmem:[#allocation6 + $0x38] sm:$0xff]  ;;  %vm236_vm3 = vcmask 261120   ;;  %vm144_vm4 = vcmask 1043456  }
  0x4e   :  { %2221 = vmatprep.subr.bf16.mxu0 %v2220_v4  ;;  %v126_v10 = vld [vmem:[#allocation6 + $0x30] sm:$0xff]  ;;  %v2228_v11 = vpack.c.bf16 %v125_v8, %v124_v7  ;;  %2029 = vmatpush3.bf16.msra.mxu1 %v2639_v9  ;;  %v2642_v13 = vld [vmem:[#allocation8 + $0x8] sm:$0xff]   ;;  %v128_v18 = vld [vmem:[#allocation6 + $0x40] sm:$0xff]  ;;  %vm2525_vm5 = vmmov 1   ;;  %s2526_s28 = smov 32   ;;  %vm1834_vm7 = vcmask 261126  }
  0x4f   :  { %2223 = vmatpush3.bf16.msra.mxu0 %v2220_v4  ;;  %v118_v14 = vld [vmem:[#allocation3] sm:$0xff]  ;;  %2030 = vmatprep.subr.bf16.mxu1 %v2523_v0  ;;  %v2232_v17 = vpack.c.bf16 %v127_v12, %v126_v10  ;;  %v129_v19 = vld [vmem:[#allocation6 + $0x48] sm:$0xf]  ;;  %vm2237_vm6 = vmpackc.low %vm144_vm4, %vm2525_vm5  ;;  %vm1811_vm8 = vcmask 523264   ;;  %vm1813_vm9 = vcmask 785408   ;;  %s2528_s14 = smov [#allocation11]  }
  0x50   :  { %2225 = vmatprep.subr.bf16.mxu0 %v2224_v6  ;;  %2025 = vmatprep.mubr.msk.f32.mxu0 %vm137_vm2, %v118_v14  ;;  %v2236_v20 = vpack.c.bf16 %v129_v19, %v128_v18  ;;  %v119_v21 = vld [vmem:[#allocation3 + $0x8] sm:$0xff]  ;;  %v1870_v26 = vld [vmem:[%s3027_s2] ss:$0 sm:$0xff]  ;;  %v2682_v45 = vld [vmem:[%s3030_s5 + $0x8] sm:$0xff]   ;;  %s1858_s16 = sshll.u32 %s2528_s14, 4  ;;  %s1859_s16 = int_to_ptr.vmem [resolvable:$true] %s1858_s16 }
  0x51   :  { %v2676_v44 = vld [vmem:[%s3030_s5] sm:$0xff]   ;;  %v2686_v48 = vld [vmem:[#allocation9] sm:$0xff]   ;;  %p2490_p5 = scmp.lt.s32.totalorder %s1859_s16, %s1859_s16 }
  0x52   :  { %v92_v15 = vld [vmem:[#allocation2] sm:$0x3]  ;;  %2031 = vmatpush3.bf16.msra.mxu1 %v2642_v13  ;;  %v94_v33 = vld [vmem:[#allocation2 + $0x2] sm:$0x3] }
  0x53   :  { %2227 = vmatpush3.bf16.msra.mxu0 %v2224_v6  ;;  %v223_v16 = vpack.c.bf16 %v92_v15, %v92_v15  ;;  %2036 = vmatprep.subr.bf16.mxu1 %v2523_v0  ;;  %v96_v46 = vld [vmem:[#allocation2 + $0x4] sm:$0x3]  ;;  %v2717_v59 = vld [vmem:[%s3031_s6] ss:$0 sm:$0xff]  ;;  %v98_v12 = vld [vmem:[#allocation2 + $0x6] sm:$0x3] }
  0x54   :  { %2229 = vmatprep.subr.bf16.mxu0 %v2228_v11  ;;  %v310_v47 = vpack.c.bf16 %v96_v46, %v96_v46  ;;  %v2692_v50 = vld [vmem:[#allocation9 + $0x8] sm:$0xff]  }
  0x55   :  { %2033 = vmatmul.mubr.msk.bf16.vlgmr.msra.gmra.mrb[0].mxu1 %vm236_vm3, %v223_v16 }
  0x56   :  { %2040 = vmatprep.mubr.msk.bf16.mxu1 %vm2524_vm1, %v2523_v0  ;;  %2037 = vmatpush3.bf16.msra.mxu1 %v2676_v44 }
  0x57   :  { %2231 = vmatpush3.bf16.msra.mxu0 %v2228_v11  ;;  %2038 = vmatprep.subr.bf16.mxu1 %v2523_v0 }
  0x58   :  { %2233 = vmatprep.subr.bf16.mxu0 %v2232_v17 }
  0x5a   :  { %2039 = vmatpush3.bf16.msra.mxu1 %v2682_v45 }
  0x5b   :  { %2235 = vmatpush3.bf16.msra.mxu0 %v2232_v17  ;;  %2044 = vmatprep.subr.bf16.mxu1 %v2523_v0 }
  0x5c   :  { %2238 = vmatprep.subr.msk.bf16.mxu0 %vm2237_vm6, %v2236_v20 }
  0x5d   :  { %2041 = vmatmul.mubr.msk.bf16.vlgmr.msra.gmra.mrb[4].mxu1 %vm236_vm3, %v310_v47 }
  0x5e   :  { %2045 = vmatpush3.bf16.msra.mxu1 %v2686_v48  ;;  %2048 = vmatprep.mubr.msk.bf16.mxu1 %vm2524_vm1, %v2523_v0 }
  0x5f   :  { %2241 = vmatpush3.bf16.msk.msra.mxu0 %vm2237_vm6, %v2236_v20  ;;  %2046 = vmatprep.subr.bf16.mxu1 %v2523_v0 }
  0x60   :  { %2052 = vmatprep.subr.bf16.mxu0 %v2523_v0 }
  0x62   :  { %2026 = vmatmul.mubr.msk.f32.vlgmr.msra.gmra.mrb[0].mxu0 %vm137_vm2, %v119_v21  ;;  %2047 = vmatpush3.bf16.msra.mxu1 %v2692_v50 }
  0x63   :  { %2053 = vmatpush3.bf16.msra.mxu0 %v2639_v9  ;;  %2056 = vmatprep.mubr.msk.bf16.mxu0 %vm2524_vm1, %v2523_v0 }
  0x64   :  { %2054 = vmatprep.subr.bf16.mxu0 %v2523_v0  ;;  %2060 = vmatprep.subr.bf16.mxu1 %v2523_v0 }
  0x67   :  { %2055 = vmatpush3.bf16.msra.mxu0 %v2642_v13 }
  0x68   :  { %2068 = vmatprep.subr.bf16.mxu0 %v2523_v0 }
 0x128   :  { %v274_v22 = vpop.f32.mrb[0].mxu1 }
 0x129   :  { %v2034_v23 = vpop.f32.mrb[1].mxu1 }
 0x12a   :  { %v277_v24 = vpop.f32.mrb[2].mxu1 }
 0x12b   :  { %v2035_v25 = vpop.f32.mrb[3].mxu1 }
 0x130   :  { %v360_v54 = vpop.f32.mrb[4].mxu1 }
 0x131   :  { %v2042_v55 = vpop.f32.mrb[5].mxu1 }
 0x132   :  { %v363_v56 = vpop.f32.mrb[6].mxu1 }
 0x133   :  { %v2043_v57 = vpop.f32.mrb[7].mxu1 }
 0x135   :  { %v2027_v27 = vpop.f32.mrb[0].mxu0 }
 0x136   :  { %v2662_v28 = vadd.f32 %v2027_v27, %v1870_v26  ;;  %v214_v29 = vpop.f32.mrb[1].mxu0 }
 0x137   :  { %v2664_v30 = vadd.f32 %v1870_v26, %v214_v29 }
 0x139   :  { %v280_v31 = vadd.f32 %v274_v22, %v2664_v30 }
 0x13b   :  { %2262 = vtanh.f32 %v280_v31  ;;  %v1877_v34 = vmul.f32 -1.442695, %v280_v31 }
 0x13d   :  { %2264 = vpow2.f32 %v1877_v34 }
 0x145   :  { %v2263_v32 = vpop.eup %2262 }
 0x146   :  { %294 = vrot.lane.b32.xlu0 %v2263_v32, %s2520_s0 }
 0x147   :  { %v2265_v35 = vpop.eup %2264 }
 0x148   :  { %v284_v36 = vadd.f32 1.0, %v2265_v35 }
 0x14a   :  { %289 = vrot.lane.b32.xlu0 %v94_v33, %s2526_s28  ;;  %2266 = vrcp.f32 %v284_v36 }
 0x154   :  { %v2267_v37 = vpop.eup %2266 }
 0x1b8   :  { %v295_v38 = vpop.permute.xlu0 %294 }
 0x1b9   :  { %v297_v39 = vmul.f32 %v2267_v37, %v295_v38 }
 0x1bb   :  { %299 = vrot.lane.b32.xlu1 %v297_v39, %s2526_s28 }
 0x1bc   :  { %v290_v40 = vpop.permute.xlu0 %289 }
 0x1bd   :  { %v292_v41 = vmul.f32 %v2267_v37, %v290_v40 }
 0x22d   :  { %v300_v42 = vpop.permute.xlu1 %299 }
 0x22e   :  { %v2670_v43 = vadd.f32 %v300_v42, %v292_v41 }
 0x230   :  { %2268 = vtanh.f32 %v2670_v43  ;;  %v505_v27 = vrot.slane %v2670_v43, 6 }
 0x23a   :  { %v2269_v49 = vpop.eup %2268 }
 0x23b   :  { %305 = vrot.lane.b32.xlu1 %v2269_v49, %s2520_s0 }
 0x2ad   :  { %v306_v51 = vpop.permute.xlu1 %305 }
 0x2ae   :  { %v308_v52 = vmul.f32 %v2267_v37, %v306_v51 }
 0x2b0   :  { %v309_v53 = vpack.c.bf16 %v308_v52, %v308_v52 }
 0x2b2   :  { %367 = vrot.lane.b32.xlu0 %v309_v53, %s2526_s28 }
 0x324   :  { %v368_v58 = vpop.permute.xlu0 %367 }
 0x325   :  { %2049 = vmatmul.mubr.msk.bf16.vlgmr.msra.gmra.mrb[8].mxu1 %vm236_vm3, %v368_v58  ;;  %2057 = vmatmul.mubr.msk.bf16.vlgmr.msra.gmra.mrb[4].mxu0 %vm236_vm3, %v368_v58 }
 0x326   :  { %2061 = vmatpush3.bf16.msra.mxu1 %v2676_v44  ;;  %2069 = vmatpush3.bf16.msra.mxu0 %v2686_v48 }
 0x327   :  { %2062 = vmatprep.subr.bf16.mxu1 %v2523_v0  ;;  %2070 = vmatprep.subr.bf16.mxu0 %v2523_v0 }
 0x328   :  { %2064 = vmatprep.mubr.msk.bf16.mxu1 %vm2524_vm1, %v2523_v0  ;;  %2072 = vmatprep.mubr.msk.bf16.mxu0 %vm2524_vm1, %v2523_v0 }
 0x32a   :  { %2063 = vmatpush3.bf16.msra.mxu1 %v2682_v45  ;;  %2071 = vmatpush3.bf16.msra.mxu0 %v2692_v50 }
 0x32b   :  { %2076 = vmatprep.subr.bf16.mxu1 %v2523_v0  ;;  %2084 = vmatprep.subr.bf16.mxu0 %v2523_v0 }
 0x3f8   :  { %v418_v60 = vpop.f32.mrb[8].mxu1  ;;  %v487_v61 = vpop.f32.mrb[4].mxu0 }
 0x3f9   :  { %v419_v62 = vadd.f32 %v418_v60, %v360_v54  ;;  %v494_v63 = vrot.slane %v487_v61, 6  ;;  %v2050_v1 = vpop.f32.mrb[9].mxu1  ;;  %v2058_v2 = vpop.f32.mrb[5].mxu0 }
 0x3fa   :  { %v421_v3 = vpop.f32.mrb[10].mxu1  ;;  %v490_v4 = vpop.f32.mrb[6].mxu0 }
 0x3fb   :  { %v424_v5 = vadd.f32 %v2717_v59, %v419_v62  ;;  %v496_v6 = vadd.f32 %v494_v63, %v2664_v30  ;;  %v2051_v7 = vpop.f32.mrb[11].mxu1  ;;  %v2059_v8 = vpop.f32.mrb[7].mxu0 }
 0x3fd   :  { %2270 = vtanh.f32 %v424_v5  ;;  %v1884_v14 = vmul.f32 -1.442695, %v424_v5  ;;  %v1886_v15 = vmul.f32 -1.442695, %v496_v6 }
 0x3fe   :  { %2272 = vtanh.f32 %v496_v6 }
 0x3ff   :  { %2274 = vpow2.f32 %v1884_v14 }
 0x400   :  { %2276 = vpow2.f32 %v1886_v15 }
 0x407   :  { %v2271_v10 = vpop.eup %2270 }
 0x408   :  { %v2273_v11 = vpop.eup %2272  ;;  %438 = vrot.lane.b32.xlu1 %v2271_v10, %s2520_s0 }
 0x409   :  { %509 = vrot.lane.b32.xlu0 %v2273_v11, %s2520_s0  ;;  %v2275_v16 = vpop.eup %2274 }
 0x40a   :  { %v2277_v17 = vpop.eup %2276  ;;  %v428_v18 = vadd.f32 1.0, %v2275_v16 }
 0x40b   :  { %v500_v19 = vadd.f32 1.0, %v2277_v17 }
 0x40c   :  { %433 = vrot.lane.b32.xlu1 %v98_v12, %s2526_s28  ;;  %2278 = vrcp.f32 %v428_v18 }
 0x40d   :  { %2280 = vrcp.f32 %v500_v19 }
 0x416   :  { %v2279_v20 = vpop.eup %2278 }
 0x417   :  { %v2281_v22 = vpop.eup %2280 }
 0x418   :  { %v507_v31 = vmul.f32 %v2281_v22, %v505_v27 }
 0x47a   :  { %v439_v21 = vpop.permute.xlu1 %438 }
 0x47b   :  { %v510_v23 = vpop.permute.xlu0 %509  ;;  %v441_v24 = vmul.f32 %v2279_v20, %v439_v21 }
 0x47c   :  { %v512_v25 = vmul.f32 %v2281_v22, %v510_v23 }
 0x47d   :  { %443 = vrot.lane.b32.xlu0 %v441_v24, %s2526_s28 }
 0x47e   :  { %514 = vrot.lane.b32.xlu1 %v512_v25, %s2526_s28  ;;  %v434_v26 = vpop.permute.xlu1 %433 }
 0x47f   :  { %v436_v29 = vmul.f32 %v2279_v20, %v434_v26 }
 0x4ef   :  { %v444_v32 = vpop.permute.xlu0 %443 }
 0x4f0   :  { %v515_v33 = vpop.permute.xlu1 %514  ;;  %v2727_v34 = vadd.f32 %v444_v32, %v436_v29 }
 0x4f1   :  { %v2729_v35 = vadd.f32 %v515_v33, %v507_v31 }
 0x4f2   :  { %2282 = vtanh.f32 %v2727_v34 }
 0x4f3   :  { %2284 = vtanh.f32 %v2729_v35  ;;  %v696_v24 = vrot.slane %v2729_v35, 6 }
 0x4fc   :  { %v2283_v36 = vpop.eup %2282 }
 0x4fd   :  { %v2285_v37 = vpop.eup %2284  ;;  %449 = vrot.lane.b32.xlu0 %v2283_v36, %s2520_s0 }
 0x4fe   :  { %520 = vrot.lane.b32.xlu1 %v2285_v37, %s2520_s0 }
 0x56f   :  { %v450_v38 = vpop.permute.xlu0 %449 }
 0x570   :  { %v521_v39 = vpop.permute.xlu1 %520  ;;  %v2735_v40 = vmul.f32 %v2279_v20, %v450_v38 }
 0x571   :  { %v523_v41 = vmul.f32 %v2281_v22, %v521_v39 }
 0x572   :  { %v525_v42 = vpack.c.bf16 %v2735_v40, %v2735_v40 }
 0x573   :  { %v524_v43 = vpack.c.bf16 %v523_v41, %v523_v41 }
 0x574   :  { %527 = vrot.lane.b32.xlu0 %v525_v42, %s2526_s28 }
 0x575   :  { %v573_v46 = vrot.slane %v524_v43, 1 }
 0x577   :  { %574 = vrot.lane.b32.xlu1 %v573_v46, %s2526_s28 }
 0x5e6   :  { %v528_v47 = vpop.permute.xlu0 %527 }
 0x5e7   :  { %2065 = vmatmul.mubr.msk.bf16.vlgmr.msra.gmra.mrb[12].mxu1 %vm236_vm3, %v528_v47 }
 0x5e8   :  { %2077 = vmatpush3.bf16.msra.mxu1 %v2639_v9  ;;  %2080 = vmatprep.mubr.msk.bf16.mxu1 %vm2524_vm1, %v2523_v0 }
 0x5e9   :  { %v575_v49 = vpop.permute.xlu1 %574  ;;  %2078 = vmatprep.subr.bf16.mxu1 %v2523_v0 }
 0x5ea   :  { %2073 = vmatmul.mubr.msk.bf16.vlgmr.msra.gmra.mrb[8].mxu0 %vm236_vm3, %v575_v49 }
 0x5eb   :  { %2085 = vmatpush3.bf16.msra.mxu0 %v2676_v44  ;;  %2088 = vmatprep.mubr.msk.bf16.mxu0 %vm2524_vm1, %v2523_v0 }
 0x5ec   :  { %2079 = vmatpush3.bf16.msra.mxu1 %v2642_v13  ;;  %2086 = vmatprep.subr.bf16.mxu0 %v2523_v0 }
 0x5ed   :  { %2092 = vmatprep.subr.bf16.mxu1 %v2523_v0 }
 0x5ef   :  { %2081 = vmatmul.mubr.msk.bf16.vlgmr.msra.gmra.mrb[16].mxu1 %vm236_vm3, %v575_v49  ;;  %2087 = vmatpush3.bf16.msra.mxu0 %v2682_v45 }
 0x5f0   :  { %2100 = vmatprep.subr.bf16.mxu0 %v2523_v0  ;;  %2093 = vmatpush3.bf16.msra.mxu1 %v2686_v48 }
 0x5f1   :  { %2094 = vmatprep.subr.bf16.mxu1 %v2523_v0  ;;  %2096 = vmatprep.mubr.msk.bf16.mxu1 %vm2524_vm1, %v2523_v0 }
 0x5f4   :  { %2095 = vmatpush3.bf16.msra.mxu1 %v2692_v50 }
 0x5f5   :  { %2108 = vmatprep.subr.bf16.mxu1 %v2523_v0 }
 0x6ba   :  { %v566_v51 = vpop.f32.mrb[12].mxu1 }
 0x6bb   :  { %v2066_v52 = vpop.f32.mrb[13].mxu1 }
 0x6bc   :  { %v569_v53 = vpop.f32.mrb[14].mxu1 }
 0x6bd   :  { %v613_v54 = vpop.f32.mrb[8].mxu0  ;;  %v2067_v55 = vpop.f32.mrb[15].mxu1 }
 0x6be   :  { %v614_v56 = vadd.f32 %v613_v54, %v566_v51  ;;  %v2074_v57 = vpop.f32.mrb[9].mxu0 }
 0x6bf   :  { %v616_v58 = vpop.f32.mrb[10].mxu0 }
 0x6c0   :  { %v619_v60 = vadd.f32 %v2717_v59, %v614_v56  ;;  %v2075_v61 = vpop.f32.mrb[11].mxu0 }
 0x6c2   :  { %2286 = vtanh.f32 %v619_v60  ;;  %v678_v62 = vpop.f32.mrb[16].mxu1  ;;  %v1889_v7 = vmul.f32 -1.442695, %v619_v60 }
 0x6c3   :  { %v685_v63 = vrot.slane %v678_v62, 4  ;;  %v2082_v1 = vpop.f32.mrb[17].mxu1 }
 0x6c4   :  { %v681_v2 = vpop.f32.mrb[18].mxu1 }
 0x6c5   :  { %v687_v3 = vadd.f32 %v685_v63, %v2664_v30  ;;  %v2083_v4 = vpop.f32.mrb[19].mxu1 }
 0x6c7   :  { %2288 = vtanh.f32 %v687_v3  ;;  %v1891_v8 = vmul.f32 -1.442695, %v687_v3 }
 0x6c8   :  { %2290 = vpow2.f32 %v1889_v7 }
 0x6c9   :  { %2292 = vpow2.f32 %v1891_v8 }
 0x6cc   :  { %v2287_v5 = vpop.eup %2286 }
 0x6cd   :  { %629 = vrot.lane.b32.xlu0 %v2287_v5, %s2520_s0 }
 0x6d1   :  { %v2289_v6 = vpop.eup %2288 }
 0x6d2   :  { %700 = vrot.lane.b32.xlu1 %v2289_v6, %s2520_s0  ;;  %v2291_v10 = vpop.eup %2290 }
 0x6d3   :  { %v623_v11 = vadd.f32 1.0, %v2291_v10  ;;  %v2293_v12 = vpop.eup %2292 }
 0x6d4   :  { %v691_v14 = vadd.f32 1.0, %v2293_v12 }
 0x6d5   :  { %2294 = vrcp.f32 %v623_v11 }
 0x6d6   :  { %2296 = vrcp.f32 %v691_v14 }
 0x6df   :  { %v2295_v15 = vpop.eup %2294 }
 0x6e0   :  { %v2297_v18 = vpop.eup %2296  ;;  %v627_v21 = vmul.f32 %v2295_v15, %v2727_v34 }
 0x6e1   :  { %v698_v25 = vmul.f32 %v2297_v18, %v696_v24 }
 0x73f   :  { %v630_v16 = vpop.permute.xlu0 %629 }
 0x740   :  { %v632_v17 = vmul.f32 %v2295_v15, %v630_v16 }
 0x742   :  { %634 = vrot.lane.b32.xlu0 %v632_v17, %s2526_s28 }
 0x744   :  { %v701_v19 = vpop.permute.xlu1 %700 }
 0x745   :  { %v703_v20 = vmul.f32 %v2297_v18, %v701_v19 }
 0x747   :  { %705 = vrot.lane.b32.xlu1 %v703_v20, %s2526_s28 }
 0x7b4   :  { %v635_v22 = vpop.permute.xlu0 %634 }
 0x7b5   :  { %v2769_v23 = vadd.f32 %v635_v22, %v627_v21 }
 0x7b7   :  { %2298 = vtanh.f32 %v2769_v23 }
 0x7b9   :  { %v706_v26 = vpop.permute.xlu1 %705 }
 0x7ba   :  { %v2773_v27 = vadd.f32 %v706_v26, %v698_v25 }
 0x7bc   :  { %2300 = vtanh.f32 %v2773_v27 }
 0x7c1   :  { %v2299_v29 = vpop.eup %2298 }
 0x7c2   :  { %640 = vrot.lane.b32.xlu0 %v2299_v29, %s2520_s0 }
 0x7c6   :  { %v2301_v31 = vpop.eup %2300 }
 0x7c7   :  { %711 = vrot.lane.b32.xlu1 %v2301_v31, %s2520_s0 }
 0x834   :  { %v641_v32 = vpop.permute.xlu0 %640 }
 0x835   :  { %v2778_v33 = vmul.f32 %v2295_v15, %v641_v32  ;;  %v887_v15 = vrot.slane %v2773_v27, 6 }
 0x837   :  { %v716_v34 = vpack.c.bf16 %v2778_v33, %v2778_v33 }
 0x839   :  { %718 = vrot.lane.b32.xlu0 %v716_v34, %s2526_s28  ;;  %v712_v35 = vpop.permute.xlu1 %711 }
 0x83a   :  { %v714_v36 = vmul.f32 %v2297_v18, %v712_v35 }
 0x83c   :  { %v715_v37 = vpack.c.bf16 %v714_v36, %v714_v36 }
 0x83e   :  { %v764_v38 = vrot.slane %v715_v37, 2 }
 0x840   :  { %765 = vrot.lane.b32.xlu1 %v764_v38, %s2526_s28 }
 0x8ab   :  { %v719_v39 = vpop.permute.xlu0 %718 }
 0x8ac   :  { %2089 = vmatmul.mubr.msk.bf16.vlgmr.msra.gmra.mrb[12].mxu0 %vm236_vm3, %v719_v39 }
 0x8ad   :  { %2101 = vmatpush3.bf16.msra.mxu0 %v2639_v9  ;;  %2104 = vmatprep.mubr.msk.bf16.mxu0 %vm2524_vm1, %v2523_v0 }
 0x8ae   :  { %2102 = vmatprep.subr.bf16.mxu0 %v2523_v0 }
 0x8b1   :  { %2103 = vmatpush3.bf16.msra.mxu0 %v2642_v13 }
 0x8b2   :  { %v766_v41 = vpop.permute.xlu1 %765  ;;  %2116 = vmatprep.subr.bf16.mxu0 %v2523_v0 }
 0x8b3   :  { %2097 = vmatmul.mubr.msk.bf16.vlgmr.msra.gmra.mrb[20].mxu1 %vm236_vm3, %v766_v41 }
 0x8b4   :  { %2105 = vmatmul.mubr.msk.bf16.vlgmr.msra.gmra.mrb[16].mxu0 %vm236_vm3, %v766_v41  ;;  %2109 = vmatpush3.bf16.msra.mxu1 %v2676_v44 }
 0x8b5   :  { %2117 = vmatpush3.bf16.msra.mxu0 %v2686_v48  ;;  %2110 = vmatprep.subr.bf16.mxu1 %v2523_v0 }
 0x8b6   :  { %2118 = vmatprep.subr.bf16.mxu0 %v2523_v0  ;;  %2112 = vmatprep.mubr.msk.bf16.mxu1 %vm2524_vm1, %v2523_v0 }
 0x8b7   :  { %2120 = vmatprep.mubr.msk.bf16.mxu0 %vm2524_vm1, %v2523_v0 }
 0x8b8   :  { %2111 = vmatpush3.bf16.msra.mxu1 %v2682_v45 }
 0x8b9   :  { %2119 = vmatpush3.bf16.msra.mxu0 %v2692_v50  ;;  %2124 = vmatprep.subr.bf16.mxu1 %v2523_v0 }
 0x8ba   :  { %2132 = vmatprep.subr.bf16.mxu0 %v2523_v0 }
 0x97f   :  { %v757_v42 = vpop.f32.mrb[12].mxu0 }
 0x980   :  { %v2090_v43 = vpop.f32.mrb[13].mxu0 }
 0x981   :  { %v760_v46 = vpop.f32.mrb[14].mxu0 }
 0x982   :  { %v2091_v47 = vpop.f32.mrb[15].mxu0 }
 0x986   :  { %v804_v49 = vpop.f32.mrb[20].mxu1 }
 0x987   :  { %v805_v51 = vadd.f32 %v804_v49, %v757_v42  ;;  %v869_v52 = vpop.f32.mrb[16].mxu0  ;;  %v2098_v53 = vpop.f32.mrb[21].mxu1 }
 0x988   :  { %v876_v54 = vrot.slane %v869_v52, 2  ;;  %v2106_v55 = vpop.f32.mrb[17].mxu0  ;;  %v807_v56 = vpop.f32.mrb[22].mxu1 }
 0x989   :  { %v810_v57 = vadd.f32 %v2717_v59, %v805_v51  ;;  %v872_v58 = vpop.f32.mrb[18].mxu0  ;;  %v2099_v60 = vpop.f32.mrb[23].mxu1 }
 0x98a   :  { %v878_v61 = vadd.f32 %v876_v54, %v2664_v30  ;;  %v2107_v62 = vpop.f32.mrb[19].mxu0 }
 0x98b   :  { %2302 = vtanh.f32 %v810_v57  ;;  %v1894_v2 = vmul.f32 -1.442695, %v810_v57 }
 0x98c   :  { %2304 = vtanh.f32 %v878_v61  ;;  %v1896_v3 = vmul.f32 -1.442695, %v878_v61 }
 0x98d   :  { %2306 = vpow2.f32 %v1894_v2 }
 0x98e   :  { %2308 = vpow2.f32 %v1896_v3 }
 0x995   :  { %v2303_v63 = vpop.eup %2302 }
 0x996   :  { %v2305_v1 = vpop.eup %2304  ;;  %820 = vrot.lane.b32.xlu1 %v2303_v63, %s2520_s0 }
 0x997   :  { %891 = vrot.lane.b32.xlu0 %v2305_v1, %s2520_s0  ;;  %v2307_v4 = vpop.eup %2306 }
 0x998   :  { %v2309_v5 = vpop.eup %2308  ;;  %v814_v6 = vadd.f32 1.0, %v2307_v4 }
 0x999   :  { %v882_v7 = vadd.f32 1.0, %v2309_v5 }
 0x99a   :  { %2310 = vrcp.f32 %v814_v6 }
 0x99b   :  { %2312 = vrcp.f32 %v882_v7 }
 0x9a4   :  { %v2311_v30 = vpop.eup %2310 }
 0x9a5   :  { %v2313_v10 = vpop.eup %2312  ;;  %v818_v16 = vmul.f32 %v2311_v30, %v2769_v23 }
 0x9a6   :  { %v889_v17 = vmul.f32 %v2313_v10, %v887_v15 }
 0xa08   :  { %v821_v8 = vpop.permute.xlu1 %820 }
 0xa09   :  { %v892_v11 = vpop.permute.xlu0 %891  ;;  %v823_v12 = vmul.f32 %v2311_v30, %v821_v8 }
 0xa0a   :  { %v894_v14 = vmul.f32 %v2313_v10, %v892_v11 }
 0xa0b   :  { %825 = vrot.lane.b32.xlu1 %v823_v12, %s2526_s28 }
 0xa0c   :  { %896 = vrot.lane.b32.xlu0 %v894_v14, %s2526_s28 }
 0xa7d   :  { %v826_v18 = vpop.permute.xlu1 %825 }
 0xa7e   :  { %v897_v19 = vpop.permute.xlu0 %896  ;;  %v2813_v20 = vadd.f32 %v826_v18, %v818_v16 }
 0xa7f   :  { %v2815_v21 = vadd.f32 %v897_v19, %v889_v17 }
 0xa80   :  { %2314 = vtanh.f32 %v2813_v20 }
 0xa81   :  { %2316 = vtanh.f32 %v2815_v21  ;;  %v1075_v8 = vrot.slane %v2815_v21, 6 }
 0xa8a   :  { %v2315_v22 = vpop.eup %2314 }
 0xa8b   :  { %v2317_v24 = vpop.eup %2316  ;;  %831 = vrot.lane.b32.xlu1 %v2315_v22, %s2520_s0 }
 0xa8c   :  { %902 = vrot.lane.b32.xlu0 %v2317_v24, %s2520_s0 }
 0xafd   :  { %v832_v25 = vpop.permute.xlu1 %831 }
 0xafe   :  { %v903_v26 = vpop.permute.xlu0 %902  ;;  %v2821_v23 = vmul.f32 %v2311_v30, %v832_v25 }
 0xaff   :  { %v905_v27 = vmul.f32 %v2313_v10, %v903_v26 }
 0xb00   :  { %v907_v29 = vpack.c.bf16 %v2821_v23, %v2821_v23 }
 0xb01   :  { %v906_v31 = vpack.c.bf16 %v905_v27, %v905_v27 }
 0xb02   :  { %909 = vrot.lane.b32.xlu0 %v907_v29, %s2526_s28 }
 0xb03   :  { %v955_v32 = vrot.slane %v906_v31, 3 }
 0xb05   :  { %956 = vrot.lane.b32.xlu1 %v955_v32, %s2526_s28 }
 0xb74   :  { %v910_v34 = vpop.permute.xlu0 %909 }
 0xb75   :  { %2113 = vmatmul.mubr.msk.bf16.vlgmr.msra.gmra.mrb[24].mxu1 %vm236_vm3, %v910_v34 }
 0xb76   :  { %2125 = vmatpush3.bf16.msra.mxu1 %v2639_v9  ;;  %2128 = vmatprep.mubr.msk.bf16.mxu1 %vm2524_vm1, %v2523_v0 }
 0xb77   :  { %v957_v35 = vpop.permute.xlu1 %956  ;;  %2126 = vmatprep.subr.bf16.mxu1 %v2523_v0 }
 0xb78   :  { %2121 = vmatmul.mubr.msk.bf16.vlgmr.msra.gmra.mrb[20].mxu0 %vm236_vm3, %v957_v35 }
 0xb79   :  { %2133 = vmatpush3.bf16.msra.mxu0 %v2676_v44  ;;  %2136 = vmatprep.mubr.msk.bf16.mxu0 %vm2524_vm1, %v2523_v0 }
 0xb7a   :  { %2127 = vmatpush3.bf16.msra.mxu1 %v2642_v13  ;;  %2134 = vmatprep.subr.bf16.mxu0 %v2523_v0 }
 0xb7b   :  { %2140 = vmatprep.subr.bf16.mxu1 %v2523_v0 }
 0xb7d   :  { %2129 = vmatmul.mubr.msk.bf16.vlgmr.msra.gmra.mrb[28].mxu1 %vm236_vm3, %v957_v35  ;;  %2135 = vmatpush3.bf16.msra.mxu0 %v2682_v45 }
 0xb7e   :  { %2141 = vmatpush3.bf16.msra.mxu1 %v2686_v48  ;;  %2148 = vmatprep.subr.bf16.mxu0 %v2523_v0 }
 0xb7f   :  { %2142 = vmatprep.subr.bf16.mxu1 %v2523_v0  ;;  %2144 = vmatprep.mubr.msk.bf16.mxu1 %vm2524_vm1, %v2523_v0 }
 0xb82   :  { %2143 = vmatpush3.bf16.msra.mxu1 %v2692_v50 }
 0xb83   :  { %2156 = vmatprep.subr.bf16.mxu1 %v2523_v0 }
 0xc48   :  { %v948_v36 = vpop.f32.mrb[24].mxu1 }
 0xc49   :  { %v2114_v37 = vpop.f32.mrb[25].mxu1 }
 0xc4a   :  { %v951_v38 = vpop.f32.mrb[26].mxu1 }
 0xc4b   :  { %v995_v39 = vpop.f32.mrb[20].mxu0  ;;  %v2115_v41 = vpop.f32.mrb[27].mxu1 }
 0xc4c   :  { %v996_v42 = vadd.f32 %v995_v39, %v948_v36  ;;  %v2122_v43 = vpop.f32.mrb[21].mxu0 }
 0xc4d   :  { %v998_v46 = vpop.f32.mrb[22].mxu0 }
 0xc4e   :  { %v1001_v47 = vadd.f32 %v2717_v59, %v996_v42  ;;  %v2123_v49 = vpop.f32.mrb[23].mxu0 }
 0xc50   :  { %2318 = vtanh.f32 %v1001_v47  ;;  %v1060_v51 = vpop.f32.mrb[28].mxu1  ;;  %v1899_v58 = vmul.f32 -1.442695, %v1001_v47 }
 0xc51   :  { %v1066_v52 = vadd.f32 %v1060_v51, %v2662_v28  ;;  %v2130_v53 = vpop.f32.mrb[29].mxu1 }
 0xc52   :  { %v1063_v54 = vpop.f32.mrb[30].mxu1 }
 0xc53   :  { %2320 = vtanh.f32 %v1066_v52  ;;  %v2131_v55 = vpop.f32.mrb[31].mxu1  ;;  %v1901_v60 = vmul.f32 -1.442695, %v1066_v52 }
 0xc54   :  { %2322 = vpow2.f32 %v1899_v58 }
 0xc55   :  { %2324 = vpow2.f32 %v1901_v60 }
 0xc5a   :  { %v2319_v56 = vpop.eup %2318 }
 0xc5b   :  { %1011 = vrot.lane.b32.xlu0 %v2319_v56, %s2520_s0 }
 0xc5d   :  { %v2321_v57 = vpop.eup %2320 }
 0xc5e   :  { %1079 = vrot.lane.b32.xlu1 %v2321_v57, %s2520_s0  ;;  %v2323_v61 = vpop.eup %2322 }
 0xc5f   :  { %v2325_v62 = vpop.eup %2324  ;;  %v1005_v63 = vadd.f32 1.0, %v2323_v61 }
 0xc60   :  { %v1070_v1 = vadd.f32 1.0, %v2325_v62 }
 0xc61   :  { %2326 = vrcp.f32 %v1005_v63 }
 0xc62   :  { %2328 = vrcp.f32 %v1070_v1 }
 0xc6b   :  { %v2327_v2 = vpop.eup %2326 }
 0xc6c   :  { %v2329_v5 = vpop.eup %2328  ;;  %v1009_v30 = vmul.f32 %v2327_v2, %v2813_v20 }
 0xc6d   :  { %v1077_v12 = vmul.f32 %v2329_v5, %v1075_v8 }
 0xccd   :  { %v1012_v3 = vpop.permute.xlu0 %1011 }
 0xcce   :  { %v1014_v4 = vmul.f32 %v2327_v2, %v1012_v3 }
 0xcd0   :  { %1016 = vrot.lane.b32.xlu0 %v1014_v4, %s2526_s28  ;;  %v1080_v6 = vpop.permute.xlu1 %1079 }
 0xcd1   :  { %v1082_v7 = vmul.f32 %v2329_v5, %v1080_v6 }
 0xcd3   :  { %1084 = vrot.lane.b32.xlu1 %v1082_v7, %s2526_s28 }
 0xd42   :  { %v1017_v10 = vpop.permute.xlu0 %1016 }
 0xd43   :  { %v2856_v11 = vadd.f32 %v1017_v10, %v1009_v30 }
 0xd45   :  { %2330 = vtanh.f32 %v2856_v11  ;;  %v1085_v14 = vpop.permute.xlu1 %1084 }
 0xd46   :  { %v2859_v15 = vadd.f32 %v1085_v14, %v1077_v12 }
 0xd48   :  { %2332 = vtanh.f32 %v2859_v15  ;;  %v1265_v6 = vrot.slane %v2859_v15, 6 }
 0xd4f   :  { %v2331_v16 = vpop.eup %2330 }
 0xd50   :  { %1022 = vrot.lane.b32.xlu0 %v2331_v16, %s2520_s0 }
 0xd52   :  { %v2333_v17 = vpop.eup %2332 }
 0xd53   :  { %1090 = vrot.lane.b32.xlu1 %v2333_v17, %s2520_s0 }
 0xdc2   :  { %v1023_v18 = vpop.permute.xlu0 %1022 }
 0xdc3   :  { %v2864_v19 = vmul.f32 %v2327_v2, %v1023_v18 }
 0xdc5   :  { %v1095_v20 = vpack.c.bf16 %v2864_v19, %v2864_v19  ;;  %v1091_v21 = vpop.permute.xlu1 %1090 }
 0xdc6   :  { %v1093_v22 = vmul.f32 %v2329_v5, %v1091_v21 }
 0xdc7   :  { %1097 = vrot.lane.b32.xlu0 %v1095_v20, %s2526_s28 }
 0xdc8   :  { %v1094_v24 = vpack.c.bf16 %v1093_v22, %v1093_v22 }
 0xdca   :  { %1143 = vrot.lane.b32.xlu1 %v1094_v24, %s2526_s28 }
 0xe39   :  { %v1098_v25 = vpop.permute.xlu0 %1097 }
 0xe3a   :  { %2137 = vmatmul.mubr.msk.bf16.vlgmr.msra.gmra.mrb[24].mxu0 %vm236_vm3, %v1098_v25 }
 0xe3b   :  { %2149 = vmatpush3.bf16.msra.mxu0 %v2639_v9  ;;  %2152 = vmatprep.mubr.msk.bf16.mxu0 %vm2524_vm1, %v2523_v0 }
 0xe3c   :  { %2150 = vmatprep.subr.bf16.mxu0 %v2523_v0  ;;  %v1144_v26 = vpop.permute.xlu1 %1143 }
 0xe3d   :  { %2145 = vmatmul.mubr.msk.bf16.vlgmr.msra.gmra.mrb[32].mxu1 %vm236_vm3, %v1144_v26 }
 0xe3e   :  { %2157 = vmatpush3.bf16.msra.mxu1 %v2676_v44  ;;  %2160 = vmatprep.mubr.msk.bf16.mxu1 %vm2524_vm1, %v2523_v0 }
 0xe3f   :  { %2151 = vmatpush3.bf16.msra.mxu0 %v2642_v13  ;;  %2158 = vmatprep.subr.bf16.mxu1 %v2523_v0 }
 0xe40   :  { %2164 = vmatprep.subr.bf16.mxu0 %v2523_v0 }
 0xe42   :  { %2153 = vmatmul.mubr.msk.bf16.vlgmr.msra.gmra.mrb[28].mxu0 %vm236_vm3, %v1144_v26  ;;  %2159 = vmatpush3.bf16.msra.mxu1 %v2682_v45 }
 0xe43   :  { %2165 = vmatpush3.bf16.msra.mxu0 %v2686_v48  ;;  %2172 = vmatprep.subr.bf16.mxu1 %v2523_v0 }
 0xe44   :  { %2166 = vmatprep.subr.bf16.mxu0 %v2523_v0  ;;  %2168 = vmatprep.mubr.msk.bf16.mxu0 %vm2524_vm1, %v2523_v0 }
 0xe47   :  { %2167 = vmatpush3.bf16.msra.mxu0 %v2692_v50 }
 0xe48   :  { %2180 = vmatprep.subr.bf16.mxu0 %v2523_v0 }
 0xf0d   :  { %v1136_v27 = vpop.f32.mrb[24].mxu0 }
 0xf0e   :  { %v2138_v29 = vpop.f32.mrb[25].mxu0 }
 0xf0f   :  { %v1139_v31 = vpop.f32.mrb[26].mxu0 }
 0xf10   :  { %v2139_v32 = vpop.f32.mrb[27].mxu0  ;;  %v1182_v34 = vpop.f32.mrb[32].mxu1 }
 0xf11   :  { %v1183_v35 = vadd.f32 %v1182_v34, %v1136_v27  ;;  %v2146_v36 = vpop.f32.mrb[33].mxu1 }
 0xf12   :  { %v1185_v37 = vpop.f32.mrb[34].mxu1 }
 0xf13   :  { %v1188_v38 = vadd.f32 %v2717_v59, %v1183_v35  ;;  %v2147_v39 = vpop.f32.mrb[35].mxu1 }
 0xf15   :  { %2334 = vtanh.f32 %v1188_v38  ;;  %v1247_v41 = vpop.f32.mrb[28].mxu0  ;;  %v1904_v53 = vmul.f32 -1.442695, %v1188_v38 }
 0xf16   :  { %v1254_v42 = vrot.slane %v1247_v41, 6  ;;  %v2154_v43 = vpop.f32.mrb[29].mxu0 }
 0xf17   :  { %v1250_v46 = vpop.f32.mrb[30].mxu0 }
 0xf18   :  { %v1256_v47 = vadd.f32 %v1254_v42, %v2662_v28  ;;  %v2155_v49 = vpop.f32.mrb[31].mxu0 }
 0xf1a   :  { %2336 = vtanh.f32 %v1256_v47  ;;  %v1906_v54 = vmul.f32 -1.442695, %v1256_v47 }
 0xf1b   :  { %2338 = vpow2.f32 %v1904_v53 }
 0xf1c   :  { %2340 = vpow2.f32 %v1906_v54 }
 0xf1f   :  { %v2335_v51 = vpop.eup %2334 }
 0xf20   :  { %1198 = vrot.lane.b32.xlu0 %v2335_v51, %s2520_s0 }
 0xf24   :  { %v2337_v52 = vpop.eup %2336 }
 0xf25   :  { %1269 = vrot.lane.b32.xlu1 %v2337_v52, %s2520_s0  ;;  %v2339_v55 = vpop.eup %2338 }
 0xf26   :  { %v1192_v56 = vadd.f32 1.0, %v2339_v55  ;;  %v2341_v57 = vpop.eup %2340 }
 0xf27   :  { %v1260_v58 = vadd.f32 1.0, %v2341_v57 }
 0xf28   :  { %2342 = vrcp.f32 %v1192_v56 }
 0xf29   :  { %2344 = vrcp.f32 %v1260_v58 }
 0xf32   :  { %v2343_v60 = vpop.eup %2342 }
 0xf33   :  { %v2345_v63 = vpop.eup %2344  ;;  %v1196_v3 = vmul.f32 %v2343_v60, %v2856_v11 }
 0xf34   :  { %v1267_v7 = vmul.f32 %v2345_v63, %v1265_v6 }
 0xf92   :  { %v1199_v61 = vpop.permute.xlu0 %1198 }
 0xf93   :  { %v1201_v62 = vmul.f32 %v2343_v60, %v1199_v61 }
 0xf95   :  { %1203 = vrot.lane.b32.xlu0 %v1201_v62, %s2526_s28 }
 0xf97   :  { %v1270_v1 = vpop.permute.xlu1 %1269 }
 0xf98   :  { %v1272_v2 = vmul.f32 %v2345_v63, %v1270_v1 }
 0xf9a   :  { %1274 = vrot.lane.b32.xlu1 %v1272_v2, %s2526_s28 }
0x1007   :  { %v1204_v4 = vpop.permute.xlu0 %1203 }
0x1008   :  { %v2898_v5 = vadd.f32 %v1204_v4, %v1196_v3 }
0x100a   :  { %2346 = vtanh.f32 %v2898_v5 }
0x100c   :  { %v1275_v30 = vpop.permute.xlu1 %1274 }
0x100d   :  { %v2902_v8 = vadd.f32 %v1275_v30, %v1267_v7 }
0x100f   :  { %2348 = vtanh.f32 %v2902_v8  ;;  %v1456_v56 = vrot.slane %v2902_v8, 6 }
0x1014   :  { %v2347_v10 = vpop.eup %2346 }
0x1015   :  { %1209 = vrot.lane.b32.xlu0 %v2347_v10, %s2520_s0 }
0x1019   :  { %v2349_v12 = vpop.eup %2348 }
0x101a   :  { %1280 = vrot.lane.b32.xlu1 %v2349_v12, %s2520_s0  ;;  %v2390_v12 = vld [vmem:[#allocation8] sm:$0xff]  }
0x1087   :  { %v1210_v11 = vpop.permute.xlu0 %1209 }
0x1088   :  { %v2907_v14 = vmul.f32 %v2343_v60, %v1210_v11 }
0x108a   :  { %v1285_v15 = vpack.c.bf16 %v2907_v14, %v2907_v14 }
0x108c   :  { %v1281_v16 = vpop.permute.xlu1 %1280  ;;  %1287 = vrot.lane.b32.xlu0 %v1285_v15, %s2526_s28  ;;  %v2391_v15 = vld [vmem:[%s3030_s5] sm:$0xff]  }
0x108d   :  { %v1283_v17 = vmul.f32 %v2345_v63, %v1281_v16  ;;  %v2392_v16 = vld [vmem:[#allocation8 + $0x8] sm:$0xff]  }
0x108f   :  { %v1284_v18 = vpack.c.bf16 %v1283_v17, %v1283_v17  ;;  %v2393_v17 = vld [vmem:[%s3030_s5 + $0x8] sm:$0xff]  }
0x1091   :  { %v1333_v20 = vrot.slane %v1284_v18, 1  ;;  %v2394_v18 = vld [vmem:[#allocation9] sm:$0xff]  }
0x1093   :  { %1334 = vrot.lane.b32.xlu1 %v1333_v20, %s2526_s28  ;;  %v2395_v20 = vld [vmem:[#allocation9 + $0x8] sm:$0xff]  }
0x10fe   :  { %v1288_v21 = vpop.permute.xlu0 %1287 }
0x10ff   :  { %2161 = vmatmul.mubr.msk.bf16.vlgmr.msra.gmra.mrb[36].mxu1 %vm236_vm3, %v1288_v21 }
0x1100   :  { %2173 = vmatpush3.bf16.msra.mxu1 %v2639_v9  ;;  %2176 = vmatprep.mubr.msk.bf16.mxu1 %vm2524_vm1, %v2523_v0 }
0x1101   :  { %2174 = vmatprep.subr.bf16.mxu1 %v2523_v0 }
0x1104   :  { %2175 = vmatpush3.bf16.msra.mxu1 %v2642_v13 }
0x1105   :  { %v1335_v22 = vpop.permute.xlu1 %1334  ;;  %2188 = vmatprep.subr.bf16.mxu1 %v2523_v0 }
0x1106   :  { %2169 = vmatmul.mubr.msk.bf16.vlgmr.msra.gmra.mrb[32].mxu0 %vm236_vm3, %v1335_v22 }
0x1107   :  { %2177 = vmatmul.mubr.msk.bf16.vlgmr.msra.gmra.mrb[40].mxu1 %vm236_vm3, %v1335_v22  ;;  %2181 = vmatpush3.bf16.msra.mxu0 %v2676_v44 }
0x1108   :  { %2182 = vmatprep.subr.bf16.mxu0 %v2523_v0  ;;  %2189 = vmatpush3.bf16.msra.mxu1 %v2686_v48 }
0x1109   :  { %2184 = vmatprep.mubr.msk.bf16.mxu0 %vm2524_vm1, %v2523_v0  ;;  %2190 = vmatprep.subr.bf16.mxu1 %v2523_v0 }
0x110a   :  { %2192 = vmatprep.mubr.msk.bf16.mxu1 %vm2524_vm1, %v2523_v0 }
0x110b   :  { %2183 = vmatpush3.bf16.msra.mxu0 %v2682_v45 }
0x110c   :  { %2196 = vmatprep.subr.bf16.mxu0 %v2523_v0  ;;  %2191 = vmatpush3.bf16.msra.mxu1 %v2692_v50 }
0x110d   :  { %2204 = vmatprep.subr.bf16.mxu1 %v2523_v0 }
0x11d2   :  { %v1326_v9 = vpop.f32.mrb[36].mxu1 }
0x11d3   :  { %v2162_v13 = vpop.f32.mrb[37].mxu1 }
0x11d4   :  { %v1329_v44 = vpop.f32.mrb[38].mxu1 }
0x11d5   :  { %v2163_v48 = vpop.f32.mrb[39].mxu1 }
0x11d9   :  { %v1373_v24 = vpop.f32.mrb[32].mxu0 }
0x11da   :  { %v1374_v25 = vadd.f32 %v1373_v24, %v1326_v9  ;;  %v2170_v26 = vpop.f32.mrb[33].mxu0  ;;  %v1438_v27 = vpop.f32.mrb[40].mxu1 }
0x11db   :  { %v1376_v29 = vpop.f32.mrb[34].mxu0  ;;  %v1445_v31 = vrot.slane %v1438_v27, 4  ;;  %v2178_v32 = vpop.f32.mrb[41].mxu1 }
0x11dc   :  { %v1379_v34 = vadd.f32 %v2717_v59, %v1374_v25  ;;  %v2171_v45 = vpop.f32.mrb[35].mxu0  ;;  %v1441_v35 = vpop.f32.mrb[42].mxu1 }
0x11dd   :  { %v1447_v36 = vadd.f32 %v1445_v31, %v2662_v28  ;;  %v2179_v50 = vpop.f32.mrb[43].mxu1 }
0x11de   :  { %2350 = vtanh.f32 %v1379_v34  ;;  %v1909_v39 = vmul.f32 -1.442695, %v1379_v34 }
0x11df   :  { %2352 = vtanh.f32 %v1447_v36  ;;  %v1911_v41 = vmul.f32 -1.442695, %v1447_v36 }
0x11e0   :  { %2354 = vpow2.f32 %v1909_v39 }
0x11e1   :  { %2356 = vpow2.f32 %v1911_v41 }
0x11e8   :  { %v2351_v37 = vpop.eup %2350 }
0x11e9   :  { %v2353_v38 = vpop.eup %2352  ;;  %1389 = vrot.lane.b32.xlu0 %v2351_v37, %s2520_s0 }
0x11ea   :  { %1460 = vrot.lane.b32.xlu1 %v2353_v38, %s2520_s0  ;;  %v2355_v42 = vpop.eup %2354 }
0x11eb   :  { %v2357_v43 = vpop.eup %2356  ;;  %v1383_v46 = vadd.f32 1.0, %v2355_v42 }
0x11ec   :  { %v1451_v47 = vadd.f32 1.0, %v2357_v43 }
0x11ed   :  { %2358 = vrcp.f32 %v1383_v46 }
0x11ee   :  { %2360 = vrcp.f32 %v1451_v47 }
0x11f7   :  { %v2359_v49 = vpop.eup %2358 }
0x11f8   :  { %v2361_v52 = vpop.eup %2360  ;;  %v1387_v57 = vmul.f32 %v2359_v49, %v2898_v5 }
0x11f9   :  { %v1458_v60 = vmul.f32 %v2361_v52, %v1456_v56 }
0x125b   :  { %v1390_v51 = vpop.permute.xlu0 %1389 }
0x125c   :  { %v1392_v53 = vmul.f32 %v2359_v49, %v1390_v51  ;;  %v1461_v54 = vpop.permute.xlu1 %1460 }
0x125d   :  { %v1463_v55 = vmul.f32 %v2361_v52, %v1461_v54 }
0x125e   :  { %1394 = vrot.lane.b32.xlu0 %v1392_v53, %s2526_s28 }
0x125f   :  { %1465 = vrot.lane.b32.xlu1 %v1463_v55, %s2526_s28 }
0x12d0   :  { %v1395_v58 = vpop.permute.xlu0 %1394 }
0x12d1   :  { %v2942_v61 = vadd.f32 %v1395_v58, %v1387_v57  ;;  %v1466_v62 = vpop.permute.xlu1 %1465 }
0x12d2   :  { %v2944_v63 = vadd.f32 %v1466_v62, %v1458_v60 }
0x12d3   :  { %2362 = vtanh.f32 %v2942_v61 }
0x12d4   :  { %2364 = vtanh.f32 %v2944_v63  ;;  %v1647_v54 = vrot.slane %v2944_v63, 6 }
0x12dd   :  { %v2363_v1 = vpop.eup %2362 }
0x12de   :  { %v2365_v2 = vpop.eup %2364  ;;  %1400 = vrot.lane.b32.xlu0 %v2363_v1, %s2520_s0 }
0x12df   :  { %1471 = vrot.lane.b32.xlu1 %v2365_v2, %s2520_s0 }
0x1350   :  { %v1401_v3 = vpop.permute.xlu0 %1400 }
0x1351   :  { %v2950_v4 = vmul.f32 %v2359_v49, %v1401_v3  ;;  %v1472_v5 = vpop.permute.xlu1 %1471 }
0x1352   :  { %v1474_v6 = vmul.f32 %v2361_v52, %v1472_v5 }
0x1353   :  { %v1476_v7 = vpack.c.bf16 %v2950_v4, %v2950_v4 }
0x1354   :  { %v1475_v30 = vpack.c.bf16 %v1474_v6, %v1474_v6 }
0x1355   :  { %1478 = vrot.lane.b32.xlu0 %v1476_v7, %s2526_s28 }
0x1356   :  { %v1524_v8 = vrot.slane %v1475_v30, 2 }
0x1358   :  { %1525 = vrot.lane.b32.xlu1 %v1524_v8, %s2526_s28 }
0x13c7   :  { %v1479_v10 = vpop.permute.xlu0 %1478 }
0x13c8   :  { %2185 = vmatmul.mubr.msk.bf16.vlgmr.msra.gmra.mrb[36].mxu0 %vm236_vm3, %v1479_v10 }
0x13c9   :  { %2197 = vmatpush3.bf16.msra.mxu0 %v2390_v12  ;;  %2200 = vmatprep.mubr.msk.bf16.mxu0 %vm2524_vm1, %v2523_v0 }
0x13ca   :  { %2198 = vmatprep.subr.bf16.mxu0 %v2523_v0  ;;  %v1526_v11 = vpop.permute.xlu1 %1525 }
0x13cb   :  { %2193 = vmatmul.mubr.msk.bf16.vlgmr.msra.gmra.mrb[44].mxu1 %vm236_vm3, %v1526_v11 }
0x13cc   :  { %2205 = vmatpush3.bf16.msra.mxu1 %v2391_v15  ;;  %2208 = vmatprep.mubr.msk.bf16.mxu1 %vm2524_vm1, %v2523_v0 }
0x13cd   :  { %2199 = vmatpush3.bf16.msra.mxu0 %v2392_v16  ;;  %2206 = vmatprep.subr.bf16.mxu1 %v2523_v0 }
0x13ce   :  { %2212 = vmatprep.subr.bf16.mxu0 %v2523_v0 }
0x13d0   :  { %2201 = vmatmul.mubr.msk.bf16.vlgmr.msra.gmra.mrb[40].mxu0 %vm236_vm3, %v1526_v11  ;;  %2207 = vmatpush3.bf16.msra.mxu1 %v2393_v17 }
0x13d1   :  { %2213 = vmatpush3.bf16.msra.mxu0 %v2394_v18  ;;  %2216 = vmatprep.mubr.msk.bf16.mxu0 %vm2524_vm1, %v2523_v0  ;;  %v2396_v18 = vld [vmem:[%s3031_s6] ss:$0 sm:$0xff]  ;;  %s2527_s6 = smov 96  }
0x13d2   :  { %2214 = vmatprep.subr.bf16.mxu0 %v2523_v0 }
0x13d5   :  { %2215 = vmatpush3.bf16.msra.mxu0 %v2395_v20 }
0x149b   :  { %v1517_v21 = vpop.f32.mrb[36].mxu0 }
0x149c   :  { %v2186_v22 = vpop.f32.mrb[37].mxu0 }
0x149d   :  { %v1520_v9 = vpop.f32.mrb[38].mxu0 }
0x149e   :  { %v2187_v13 = vpop.f32.mrb[39].mxu0  ;;  %v1564_v44 = vpop.f32.mrb[44].mxu1 }
0x149f   :  { %v1565_v48 = vadd.f32 %v1564_v44, %v1517_v21  ;;  %v2194_v24 = vpop.f32.mrb[45].mxu1 }
0x14a0   :  { %v1567_v25 = vpop.f32.mrb[46].mxu1 }
0x14a1   :  { %v1570_v26 = vadd.f32 %v2717_v59, %v1565_v48  ;;  %v2195_v27 = vpop.f32.mrb[47].mxu1 }
0x14a3   :  { %2366 = vtanh.f32 %v1570_v26  ;;  %v1629_v29 = vpop.f32.mrb[40].mxu0  ;;  %v1914_v50 = vmul.f32 -1.442695, %v1570_v26 }
0x14a4   :  { %v1636_v31 = vrot.slane %v1629_v29, 2  ;;  %v2202_v32 = vpop.f32.mrb[41].mxu0 }
0x14a5   :  { %v1632_v34 = vpop.f32.mrb[42].mxu0 }
0x14a6   :  { %v1638_v0 = vadd.f32 %v1636_v31, %v2662_v28  ;;  %v2203_v45 = vpop.f32.mrb[43].mxu0 }
0x14a8   :  { %2368 = vtanh.f32 %v1638_v0  ;;  %v1916_v37 = vmul.f32 -1.442695, %v1638_v0 }
0x14a9   :  { %2370 = vpow2.f32 %v1914_v50 }
0x14aa   :  { %2372 = vpow2.f32 %v1916_v37 }
0x14ad   :  { %v2367_v35 = vpop.eup %2366 }
0x14ae   :  { %1580 = vrot.lane.b32.xlu1 %v2367_v35, %s2520_s0 }
0x14b2   :  { %v2369_v36 = vpop.eup %2368 }
0x14b3   :  { %1651 = vrot.lane.b32.xlu0 %v2369_v36, %s2520_s0  ;;  %v2371_v59 = vpop.eup %2370 }
0x14b4   :  { %v1574_v38 = vadd.f32 1.0, %v2371_v59  ;;  %v2373_v39 = vpop.eup %2372 }
0x14b5   :  { %v1642_v41 = vadd.f32 1.0, %v2373_v39 }
0x14b6   :  { %2374 = vrcp.f32 %v1574_v38 }
0x14b7   :  { %2376 = vrcp.f32 %v1642_v41 }
0x14c0   :  { %v2375_v42 = vpop.eup %2374 }
0x14c1   :  { %v2377_v46 = vpop.eup %2376  ;;  %v1578_v51 = vmul.f32 %v2375_v42, %v2942_v61 }
0x14c2   :  { %v1649_v55 = vmul.f32 %v2377_v46, %v1647_v54 }
0x1520   :  { %v1581_v28 = vpop.permute.xlu1 %1580 }
0x1521   :  { %v1583_v43 = vmul.f32 %v2375_v42, %v1581_v28 }
0x1523   :  { %1585 = vrot.lane.b32.xlu1 %v1583_v43, %s2526_s28 }
0x1525   :  { %v1652_v47 = vpop.permute.xlu0 %1651 }
0x1526   :  { %v1654_v49 = vmul.f32 %v2377_v46, %v1652_v47 }
0x1528   :  { %1656 = vrot.lane.b32.xlu0 %v1654_v49, %s2526_s28 }
0x1595   :  { %v1586_v52 = vpop.permute.xlu1 %1585 }
0x1596   :  { %v1588_v53 = vadd.f32 %v1586_v52, %v1578_v51 }
0x1598   :  { %2378 = vtanh.f32 %v1588_v53 }
0x159a   :  { %v1657_v56 = vpop.permute.xlu0 %1656 }
0x159b   :  { %v1659_v57 = vadd.f32 %v1657_v56, %v1649_v55 }
0x159d   :  { %2380 = vtanh.f32 %v1659_v57 }
0x15a2   :  { %v2379_v58 = vpop.eup %2378 }
0x15a3   :  { %1591 = vrot.lane.b32.xlu1 %v2379_v58, %s2520_s0 }
0x15a7   :  { %v2381_v60 = vpop.eup %2380 }
0x15a8   :  { %1662 = vrot.lane.b32.xlu0 %v2381_v60, %s2520_s0 }
0x1615   :  { %v1592_v62 = vpop.permute.xlu1 %1591 }
0x1616   :  { %v1594_v1 = vmul.f32 %v2375_v42, %v1592_v62 }
0x1618   :  { %v1667_v2 = vpack.c.bf16 %v1594_v1, %v1594_v1 }
0x161a   :  { %v1663_v3 = vpop.permute.xlu0 %1662  ;;  %1669 = vrot.lane.b32.xlu0 %v1667_v2, %s2526_s28 }
0x161b   :  { %v1665_v61 = vmul.f32 %v2377_v46, %v1663_v3 }
0x161d   :  { %v1666_v5 = vpack.c.bf16 %v1665_v61, %v1665_v61 }
0x161f   :  { %v1715_v63 = vrot.slane %v1666_v5, 3 }
0x1621   :  { %1716 = vrot.lane.b32.xlu1 %v1715_v63, %s2526_s28 }
0x168c   :  { %v1670_v6 = vpop.permute.xlu0 %1669 }
0x168d   :  { %2209 = vmatmul.mubr.msk.bf16.vlgmr.msra.gmra.mrb[48].mxu1 %vm236_vm3, %v1670_v6 }
0x1693   :  { %v1717_v7 = vpop.permute.xlu1 %1716 }
0x1694   :  { %2217 = vmatmul.mubr.msk.bf16.vlgmr.msra.gmra.mrb[44].mxu0 %vm236_vm3, %v1717_v7 }
0x1760   :  { %v1708_v30 = vpop.f32.mrb[48].mxu1 }
0x1761   :  { %v2210_v8 = vpop.f32.mrb[49].mxu1 }
0x1762   :  { %v1711_v10 = vpop.f32.mrb[50].mxu1 }
0x1763   :  { %v2211_v12 = vpop.f32.mrb[51].mxu1 }
0x1767   :  { %v1755_v11 = vpop.f32.mrb[44].mxu0 }
0x1768   :  { %v1756_v15 = vadd.f32 %v1755_v11, %v1708_v30  ;;  %v2218_v16 = vpop.f32.mrb[45].mxu0 }
0x1769   :  { %v1758_v17 = vpop.f32.mrb[46].mxu0 }
0x176a   :  { %v1761_v20 = vadd.f32 %v2396_v18, %v1756_v15  ;;  %v2219_v21 = vpop.f32.mrb[47].mxu0 }
0x176c   :  { %2382 = vtanh.f32 %v1761_v20  ;;  %v1919_v9 = vmul.f32 -1.442695, %v1761_v20 }
0x176e   :  { %2384 = vpow2.f32 %v1919_v9 }
0x1776   :  { %v2383_v22 = vpop.eup %2382 }
0x1777   :  { %1771 = vrot.lane.b32.xlu0 %v2383_v22, %s2520_s0 }
0x1778   :  { %v2385_v13 = vpop.eup %2384 }
0x1779   :  { %v1765_v44 = vadd.f32 1.0, %v2385_v13 }
0x177b   :  { %2386 = vrcp.f32 %v1765_v44 }
0x1785   :  { %v2387_v48 = vpop.eup %2386 }
0x1786   :  { %v1769_v26 = vmul.f32 %v2387_v48, %v1588_v53 }
0x17e9   :  { %v1772_v24 = vpop.permute.xlu0 %1771 }
0x17ea   :  { %v1774_v25 = vmul.f32 %v2387_v48, %v1772_v24 }
0x17ec   :  { %1776 = vrot.lane.b32.xlu1 %v1774_v25, %s2526_s28 }
0x17f0   :  { %1787 = vrot.lane.b32.xlu1 %v2735_v40, %s2526_s28 }
0x17f4   :  { %1799 = vrot.lane.b32.xlu1 %v2907_v14, %s2526_s28 }
0x17f8   :  { %1795 = vrot.lane.b32.xlu1 %v2821_v23, %s2527_s6 }
0x17fc   :  { %1831 = vrot.lane.b32.xlu1 %v1665_v61, %s2526_s28 }
0x185e   :  { %v1777_v27 = vpop.permute.xlu1 %1776 }
0x185f   :  { %v1779_v29 = vadd.f32 %v1777_v27, %v1769_v26 }
0x1861   :  { %2388 = vtanh.f32 %v1779_v29 }
0x1862   :  { %v1788_v31 = vpop.permute.xlu1 %1787 }
0x1866   :  { %v1800_v32 = vpop.permute.xlu1 %1799 }
0x186a   :  { %v1796_v34 = vpop.permute.xlu1 %1795 }
0x186b   :  { %v2389_v0 = vpop.eup %2388 }
0x186c   :  { %1782 = vrot.lane.b32.xlu0 %v2389_v0, %s2520_s0 }
0x186e   :  { %v1832_v40 = vpop.permute.xlu1 %1831 }
0x186f   :  { %1835 = vst.msk [vmem:[#allocation2 - $0x6] sm:$0xc0] %vm1834_vm7, %v1832_v40 }
0x1870   :  { %1791 = vrot.lane.b32.xlu0 %v2778_v33, %s2520_s0 }
0x1874   :  { %1803 = vrot.lane.b32.xlu0 %v2950_v4, %s2520_s0  ;;  %s2485_s0 = scalar_lea.vmem %s1859_s16, 64 }
0x1875   :  { %p2486_p4 = scmp.ne.s32.totalorder %s1859_s16, %s2485_s0  ;;  %p2491_p6 = scmp.lt.s32.totalorder %s2485_s0, %s2485_s0 }
0x1877   :  { %p2492_p7 = por %p2491_p6, %p2490_p5 }
0x1878   :  { %1807 = vrot.lane.b32.xlu0 %v1594_v1, %s2527_s6 }
0x1879   :  { %p2493_p8 = pnand %p2492_p7, %p2486_p4 }
0x187c   :  { %1837 = vrot.lane.b32.xlu0 %v1659_v57, %s2527_s6 }
0x1880   :  { %1848 = vrot.lane.b32.xlu0 %v1779_v29, %s2527_s6 }
0x18de   :  { %v1783_v23 = vpop.permute.xlu0 %1782 }
0x18df   :  { %v1785_v14 = vmul.f32 %v2387_v48, %v1783_v23 }
0x18e1   :  { %1842 = vrot.lane.b32.xlu1 %v1785_v14, %s2526_s28 }
0x18e2   :  { %v1792_v45 = vpop.permute.xlu0 %1791 }
0x18e3   :  { %v1810_v35 = vsel %vm236_vm3, %v1788_v31, %v1792_v45 }
0x18e4   :  { %v1812_v50 = vsel %vm1811_vm8, %v1810_v35, %v1796_v34 }
0x18e5   :  { %v1814_v38 = vsel %vm1813_vm9, %v1812_v50, %v2864_v19 }
0x18e6   :  { %v1804_v36 = vpop.permute.xlu0 %1803 }
0x18e7   :  { %v1815_v37 = vsel %vm236_vm3, %v1800_v32, %v1804_v36 }
0x18ea   :  { %v1808_v33 = vpop.permute.xlu0 %1807 }
0x18eb   :  { %v1816_v4 = vsel %vm1811_vm8, %v1815_v37, %v1808_v33 }
0x18ec   :  { %v1817_v59 = vsel %vm1813_vm9, %v1816_v4, %v1785_v14 }
0x18ed   :  { %v1820_v39 = vcombine.low %v1814_v38, %v1817_v59 }
0x18ee   :  { %v1838_v41 = vpop.permute.xlu0 %1837 }
0x18ef   :  { %1840 = vst.msk [vmem:[#allocation2 - $0x4] sm:$0xc0] %vm1834_vm7, %v1838_v41  ;;  %1920 = vst.sshfl [vmem:[#allocation11] sm:$0x33 pattern:$0x76325410] %v1820_v39 }
0x18f0   :  { %2496 = shalt.err (!%p2493_p8)
}
0x18f1   :  { %s2497_s19 = scalar_lea.hbm %s3032_s7, 64 }
0x18f2   :  { %p2498_p9 = scmp.ne.s32.totalorder %s3032_s7, %s2497_s19  ;;  %p2501_p10 = scmp.lt.u32.totalorder %s2497_s19, %s3032_s7 }
0x18f4   :  { %p2503_p11 = pnand %p2501_p10, %p2498_p9 }
0x18f6   :  { %2506 = shalt.err (!%p2503_p11)
}
0x18f7   :  { %1861 = dma.vmem_to_hbm [thread:$0]  %s1859_s16, 64, %s3032_s7, [#allocation5]   ;;  %v1849_v19 = vpop.permute.xlu0 %1848 }
0x18f8   :  { %1851 = vst.msk [vmem:[#allocation2 + $0x6] sm:$0x3] %vm87_vm0, %v1849_v19 }
0x1953   :  { %v1843_v42 = vpop.permute.xlu1 %1842 }
0x1954   :  { %1846 = vst.msk [vmem:[#allocation2 + $0x4] sm:$0x3] %vm87_vm0, %v1843_v42 }
0x1955   :  { %2513 = dma.done.wait [#allocation5], 64  }
0x1956   :  { %2514 = vsyncadd [#allocation5], 4294967232 }
0x1957   :  { %1865 = vsyncpa [#allocation4], 1 }
0x1958   :  { %1866 = vsyncpa [#allocation7], 1 }
0x1959   :  { %1867 = vsyncpa [#allocation10], 1 }
0x195a   :  { %1868 = vsyncpa [#allocation5], 1 }

</bundles_post_ra>
